<compile_context>
chip_gen: v7x
topology: tpu7x:2x2x1
jax: 0.10.0
libtpu: 0.0.40
codegen_flags: <defaults>
</compile_context>

<pallas_src>
from functools import partial

import jax
import jax.numpy as jnp
from jax import lax
from jax.experimental import pallas as pl
from jax.experimental.pallas import tpu as pltpu

BN_EPS = 1e-5
_MM_DTYPE = jnp.bfloat16           # MXU operand dtype (accumulation stays f32)
_VMEM_LIMIT = 48 * 1024 * 1024     # safe on v5e/v6e (128 MiB) and v7x (64 MiB)


# ----------------------------------------------------------------------------
# Small helpers
# ----------------------------------------------------------------------------

def _round_up(n, m):
    return ((n + m - 1) // m) * m


def _pick_tile(dim, max_tile, align):
    """Largest t <= max_tile with t % align == 0 and dim % t == 0, else dim."""
    if dim <= max_tile:
        return dim
    t = (max_tile // align) * align
    while t >= align:
        if dim % t == 0:
            return t
        t -= align
    return dim


def _bn_scale_shift(bn_params):
    gamma, beta, mean, var = bn_params
    scale = (gamma / jnp.sqrt(var + BN_EPS)).astype(jnp.float32)
    shift = (beta - mean * scale).astype(jnp.float32)
    return scale, shift


# ----------------------------------------------------------------------------
# Tiled matmul (+ affine epilogue, optional residual)
#   out = [res +] (x @ w) * scale + shift
#   Used for every 1x1 conv (bias => scale=1, shift=bias; BN => scale/shift).
# ----------------------------------------------------------------------------

def _mm_affine_kernel(x_ref, w_ref, scale_ref, shift_ref, o_ref, acc_ref):
    @pl.when(pl.program_id(2) == 0)
    def _():
        acc_ref[...] = jnp.zeros_like(acc_ref)

    acc_ref[...] += jnp.dot(x_ref[...], w_ref[...],
                            preferred_element_type=jnp.float32)

    @pl.when(pl.program_id(2) == pl.num_programs(2) - 1)
    def _():
        o_ref[...] = (acc_ref[...] * scale_ref[...]
                      + shift_ref[...]).astype(o_ref.dtype)


def _mm_affine_res_kernel(x_ref, w_ref, scale_ref, shift_ref, res_ref, o_ref,
                          acc_ref):
    @pl.when(pl.program_id(2) == 0)
    def _():
        acc_ref[...] = jnp.zeros_like(acc_ref)

    acc_ref[...] += jnp.dot(x_ref[...], w_ref[...],
                            preferred_element_type=jnp.float32)

    @pl.when(pl.program_id(2) == pl.num_programs(2) - 1)
    def _():
        o_ref[...] = (res_ref[...].astype(jnp.float32)
                      + acc_ref[...] * scale_ref[...]
                      + shift_ref[...]).astype(o_ref.dtype)


def matmul_affine(x, w, scale, shift, res=None, *, out_dtype=None,
                  tm=512, tn=512, tk=512):
    M, K = x.shape
    K2, N = w.shape
    assert K == K2
    out_dtype = out_dtype if out_dtype is not None else x.dtype

    TM = _pick_tile(M, tm, 8)
    TN = _pick_tile(N, tn, 128)
    TK = _pick_tile(K, tk, 128)
    grid = (M // TM, N // TN, K // TK)

    scale2 = scale.reshape(1, N).astype(jnp.float32)
    shift2 = shift.reshape(1, N).astype(jnp.float32)

    in_specs = [
        pl.BlockSpec((TM, TK), lambda i, j, k: (i, k)),
        pl.BlockSpec((TK, TN), lambda i, j, k: (k, j)),
        pl.BlockSpec((1, TN), lambda i, j, k: (0, j)),
        pl.BlockSpec((1, TN), lambda i, j, k: (0, j)),
    ]
    args = [x, w, scale2, shift2]
    kernel = _mm_affine_kernel
    if res is not None:
        in_specs.append(pl.BlockSpec((TM, TN), lambda i, j, k: (i, j)))
        args.append(res)
        kernel = _mm_affine_res_kernel

    flops = int(2 * M * N * K)
    bytes_accessed = int(
        x.size * x.dtype.itemsize + w.size * w.dtype.itemsize
        + M * N * jnp.dtype(out_dtype).itemsize
        + (res.size * res.dtype.itemsize if res is not None else 0))

    return pl.pallas_call(
        kernel,
        out_shape=jax.ShapeDtypeStruct((M, N), out_dtype),
        grid=grid,
        in_specs=in_specs,
        out_specs=pl.BlockSpec((TM, TN), lambda i, j, k: (i, j)),
        scratch_shapes=[pltpu.VMEM((TM, TN), jnp.float32)],
        compiler_params=pltpu.CompilerParams(
            dimension_semantics=("parallel", "parallel", "arbitrary"),
            vmem_limit_bytes=_VMEM_LIMIT),
        cost_estimate=pl.CostEstimate(flops=flops, transcendentals=0,
                                      bytes_accessed=bytes_accessed),
    )(*args)


# ----------------------------------------------------------------------------
# 3x3 conv (pad=1) + BN + ReLU
#   dx taps folded into K in the wrapper; kernel does 3 dy-shifted matmuls
#   (shift = W rows, a multiple of 8, so slices stay sublane-aligned).
# ----------------------------------------------------------------------------

def _conv3x3_bn_relu_kernel(x_ref, w_ref, scale_ref, shift_ref, o_ref, acc_ref,
                            *, H, W):
    # x_ref: (1, H+2, W, TK)   w_ref: (3, TK, TN)   o_ref: (1, H, W, TN)
    @pl.when(pl.program_id(2) == 0)
    def _():
        acc_ref[...] = jnp.zeros_like(acc_ref)

    tk = x_ref.shape[-1]
    tn = o_ref.shape[-1]
    acc = acc_ref[...]
    for dy in range(3):                         # static unroll over dy taps
        patch = x_ref[0, dy:dy + H, :, :].reshape(H * W, tk)
        acc += jnp.dot(patch, w_ref[dy], preferred_element_type=jnp.float32)
    acc_ref[...] = acc

    @pl.when(pl.program_id(2) == pl.num_programs(2) - 1)
    def _():
        y = acc_ref[...] * scale_ref[...] + shift_ref[...]
        o_ref[...] = jnp.maximum(y, 0.0).astype(o_ref.dtype).reshape(1, H, W, tn)


def conv3x3_bn_relu(x_nhwc, w_hwio, bn_params, *, out_dtype=_MM_DTYPE):
    B, H, W, Cin = x_nhwc.shape
    Cout = w_hwio.shape[-1]
    scale, shift = _bn_scale_shift(bn_params)

    # im2col along W only: fold the 3 dx taps into the contraction dim,
    # pad H by one row on each side (dy halo is handled in-kernel).
    xpad = jnp.pad(x_nhwc.astype(_MM_DTYPE), ((0, 0), (1, 1), (1, 1), (0, 0)))
    x_cat = jnp.concatenate([xpad[:, :, dx:dx + W, :] for dx in range(3)],
                            axis=-1)                      # (B, H+2, W, 3*Cin)
    wk = w_hwio.astype(_MM_DTYPE).reshape(3, 3 * Cin, Cout)  # [dy, dx*Cin+c, o]

    K = 3 * Cin
    TK = _pick_tile(K, 768, 128)
    TN = _pick_tile(Cout, 256, 128)
    grid = (B, Cout // TN, K // TK)

    # TODO(synk): for feature maps much larger than ~64x64 the per-block
    # (H+2, W, TK) strip should additionally be tiled over H row-strips.

    flops = int(2 * B * H * W * Cout * 9 * Cin)
    bytes_accessed = int(x_cat.size * x_cat.dtype.itemsize
                         + wk.size * wk.dtype.itemsize
                         + B * H * W * Cout * jnp.dtype(out_dtype).itemsize)

    kern = partial(_conv3x3_bn_relu_kernel, H=H, W=W)
    return pl.pallas_call(
        kern,
        out_shape=jax.ShapeDtypeStruct((B, H, W, Cout), out_dtype),
        grid=grid,
        in_specs=[
            pl.BlockSpec((1, H + 2, W, TK), lambda b, n, k: (b, 0, 0, k)),
            pl.BlockSpec((3, TK, TN), lambda b, n, k: (0, k, n)),
            pl.BlockSpec((1, TN), lambda b, n, k: (0, n)),
            pl.BlockSpec((1, TN), lambda b, n, k: (0, n)),
        ],
        out_specs=pl.BlockSpec((1, H, W, TN), lambda b, n, k: (b, 0, 0, n)),
        scratch_shapes=[pltpu.VMEM((H * W, TN), jnp.float32)],
        compiler_params=pltpu.CompilerParams(
            dimension_semantics=("parallel", "parallel", "arbitrary"),
            vmem_limit_bytes=_VMEM_LIMIT),
        cost_estimate=pl.CostEstimate(flops=flops, transcendentals=0,
                                      bytes_accessed=bytes_accessed),
    )(x_cat, wk, scale.reshape(1, Cout), shift.reshape(1, Cout))


# ----------------------------------------------------------------------------
# GloRe graph reasoning: projection -> GCN -> re-projection (per batch)
#   xs is (num_s, HW); xp is kept in (HW, num_n) layout so the re-projection is
#   a lax.dot_general NT contraction (no in-kernel transpose materialization).
# ----------------------------------------------------------------------------

def _glore_graph_kernel(xs_ref, xp_ref, w1t_ref, b1_ref, w2_ref, o_ref, *,
                        inv_hw):
    xs = xs_ref[0]                                         # (num_s, HW)
    xp = xp_ref[0]                                         # (HW, num_n)
    # A[s, n] = sum_hw xs[s, hw] * xp[hw, n] / HW   (== x_state @ x_proj^T / HW)
    a = jnp.dot(xs, xp, preferred_element_type=jnp.float32) * inv_hw
    # GCN conv1 (Conv1d over node dim) + bias, residual, ReLU
    h = jnp.dot(a, w1t_ref[...], preferred_element_type=jnp.float32) + b1_ref[...]
    h = jnp.maximum(h + a, 0.0)
    # GCN conv2 (Conv1d over state dim, no bias)
    g = jnp.dot(w2_ref[...], h, preferred_element_type=jnp.float32)  # (num_s, num_n)
    # Re-project back to pixels: out[hw, s] = sum_n xp[hw, n] * g[s, n]
    o_ref[0] = lax.dot_general(
        xp, g.astype(xp.dtype), (((1,), (1,)), ((), ())),
        preferred_element_type=jnp.float32).astype(o_ref.dtype)


def glore_graph(xs, xp, w1t, b1, w2):
    B, num_s, HW = xs.shape
    num_n = xp.shape[-1]
    kern = partial(_glore_graph_kernel, inv_hw=1.0 / HW)

    flops = int(2 * B * num_s * num_n * (2 * HW + num_s + num_n))
    bytes_accessed = int(xs.size * xs.dtype.itemsize
                         + xp.size * xp.dtype.itemsize
                         + B * HW * num_s * xs.dtype.itemsize)

    return pl.pallas_call(
        kern,
        out_shape=jax.ShapeDtypeStruct((B, HW, num_s), xs.dtype),
        grid=(B,),
        in_specs=[
            pl.BlockSpec((1, num_s, HW), lambda b: (b, 0, 0)),
            pl.BlockSpec((1, HW, num_n), lambda b: (b, 0, 0)),
            pl.BlockSpec((num_n, num_n), lambda b: (0, 0)),
            pl.BlockSpec((1, num_n), lambda b: (0, 0)),
            pl.BlockSpec((num_s, num_s), lambda b: (0, 0)),
        ],
        out_specs=pl.BlockSpec((1, HW, num_s), lambda b: (b, 0, 0)),
        compiler_params=pltpu.CompilerParams(
            dimension_semantics=("parallel",),
            vmem_limit_bytes=_VMEM_LIMIT),
        cost_estimate=pl.CostEstimate(flops=flops, transcendentals=0,
                                      bytes_accessed=bytes_accessed),
    )(xs, xp, w1t.astype(jnp.float32),
      b1.reshape(1, num_n).astype(jnp.float32), w2.astype(jnp.float32))


# ----------------------------------------------------------------------------
# Parameters + full forward
# ----------------------------------------------------------------------------

def init_params(key, in_channels, out_channels, num_mid=64):
    inter = in_channels // 4
    num_s, num_n = 2 * num_mid, num_mid
    ks = jax.random.split(key, 16)

    def nrm(k, shape, s=0.05):
        return s * jax.random.normal(k, shape, dtype=jnp.float32)

    def bn(k, c):
        k1, k2, k3, k4 = jax.random.split(k, 4)
        gamma = 1.0 + 0.1 * jax.random.normal(k1, (c,), jnp.float32)
        beta = 0.1 * jax.random.normal(k2, (c,), jnp.float32)
        mean = 0.1 * jax.random.normal(k3, (c,), jnp.float32)
        var = 0.5 + jnp.abs(jax.random.normal(k4, (c,), jnp.float32))
        return (gamma, beta, mean, var)

    p = {}
    # conv51: Conv2d(in, inter, 3, pad=1, bias=False) + BN + ReLU  (HWIO weight)
    p["w51"] = nrm(ks[0], (3, 3, in_channels, inter))
    p["bn51"] = bn(ks[1], inter)
    # GloRe_Unit(inter, 64): conv_state / conv_proj are 1x1 convs with bias
    p["w_state"] = nrm(ks[2], (inter, num_s))
    p["b_state"] = nrm(ks[3], (num_s,))
    p["w_proj"] = nrm(ks[4], (inter, num_n))
    p["b_proj"] = nrm(ks[5], (num_n,))
    # GCN: conv1 (Conv1d over node dim, bias) stored pre-transposed, conv2 (no bias)
    p["w1t"] = nrm(ks[6], (num_n, num_n))
    p["b1"] = nrm(ks[7], (num_n,))
    p["w2"] = nrm(ks[8], (num_s, num_s))
    # fc_2 (1x1 conv, no bias) + blocker BN
    p["w_fc2"] = nrm(ks[9], (num_s, inter))
    p["bn_blk"] = bn(ks[10], inter)
    # conv52: Conv2d(inter, inter, 3, pad=1, bias=False) + BN + ReLU
    p["w52"] = nrm(ks[11], (3, 3, inter, inter))
    p["bn52"] = bn(ks[12], inter)
    # conv6: Dropout2d (eval identity) + Conv2d(inter, out, 1, bias=True)
    p["w6"] = nrm(ks[13], (inter, out_channels))
    p["b6"] = nrm(ks[14], (out_channels,))
    return p


def gcnet_head_forward(x_nchw, params):
    B, _, H, W = x_nchw.shape
    HW = H * W
    x = jnp.transpose(x_nchw, (0, 2, 3, 1))                       # NCHW -> NHWC

    # conv51
    feat = conv3x3_bn_relu(x, params["w51"], params["bn51"])       # (B,H,W,inter) bf16
    inter = feat.shape[-1]
    feat_flat = feat.reshape(B * HW, inter)

    # --- GloRe unit ---
    num_s = params["w_state"].shape[1]
    num_n = params["w_proj"].shape[1]

    # fused conv_state | conv_proj 1x1 projection, N padded to a lane-dense width
    w_sp = jnp.concatenate([params["w_state"], params["w_proj"]], axis=1)
    b_sp = jnp.concatenate([params["b_state"], params["b_proj"]], axis=0)
    n_sp = num_s + num_n
    n_pad = _round_up(n_sp, 128)
    if n_pad != n_sp:
        w_sp = jnp.pad(w_sp, ((0, 0), (0, n_pad - n_sp)))
        b_sp = jnp.pad(b_sp, ((0, n_pad - n_sp),))
    sp = matmul_affine(feat_flat, w_sp.astype(_MM_DTYPE),
                       jnp.ones((n_pad,), jnp.float32), b_sp,
                       out_dtype=_MM_DTYPE)                        # (B*HW, n_pad)
    xs = jnp.transpose(sp[:, :num_s].reshape(B, HW, num_s), (0, 2, 1))  # (B,num_s,HW)
    xp = sp[:, num_s:n_sp].reshape(B, HW, num_n)                        # (B,HW,num_n)

    y = glore_graph(xs, xp, params["w1t"], params["b1"], params["w2"])  # (B,HW,num_s)
    y_flat = y.reshape(B * HW, num_s)

    # fc_2 (1x1, no bias) + blocker BN + residual
    scale_blk, shift_blk = _bn_scale_shift(params["bn_blk"])
    gc_feat_flat = matmul_affine(y_flat, params["w_fc2"].astype(_MM_DTYPE),
                                 scale_blk, shift_blk, res=feat_flat,
                                 out_dtype=_MM_DTYPE)
    gc_feat = gc_feat_flat.reshape(B, H, W, inter)

    # conv52
    gc_conv = conv3x3_bn_relu(gc_feat, params["w52"], params["bn52"])

    # conv6 (Dropout2d -> identity in eval, then 1x1 conv with bias),
    # out_channels padded to 128 for lane-dense stores, sliced afterwards.
    out_c = params["w6"].shape[1]
    oc_pad = _round_up(out_c, 128)
    w6, b6 = params["w6"], params["b6"]
    if oc_pad != out_c:
        w6 = jnp.pad(w6, ((0, 0), (0, oc_pad - out_c)))
        b6 = jnp.pad(b6, ((0, oc_pad - out_c),))
    out_flat = matmul_affine(gc_conv.reshape(B * HW, inter),
                             w6.astype(_MM_DTYPE),
                             jnp.ones((oc_pad,), jnp.float32), b6,
                             out_dtype=jnp.float32)
    out = out_flat[:, :out_c].reshape(B, H, W, out_c).transpose(0, 3, 1, 2)
    return (out,)


if __name__ == "__main__":
    B, in_channels, H, W = 2, 64, 16, 16
    out_channels = 4

    x = jax.random.normal(jax.random.PRNGKey(0), (B, in_channels, H, W),
                          dtype=jnp.float32)
    params = init_params(jax.random.PRNGKey(1), in_channels, out_channels)

    out = gcnet_head_forward(x, params)
    jax.block_until_ready(out)
    assert out[0].shape == (B, out_channels, H, W)
    assert bool(jnp.all(jnp.isfinite(out[0])))
    print("KERNEL_OK")
</pallas_src>

<mosaic_0001>
module attributes {stable_mosaic.version = 11 : i64} {
  func.func @_conv3x3_bn_relu_kernel(%arg0: i32, %arg1: i32, %arg2: i32, %arg3: memref<1x18x16x192xbf16, #tpu.memory_space<vmem>>, %arg4: memref<3x192x16xbf16, #tpu.memory_space<vmem>>, %arg5: memref<1x16xf32, #tpu.memory_space<vmem>>, %arg6: memref<1x16xf32, #tpu.memory_space<vmem>>, %arg7: memref<1x16x16x16xbf16, #tpu.memory_space<vmem>>, %arg8: memref<256x16xf32, #tpu.memory_space<vmem>>) attributes {dimension_semantics = [#tpu.dimension_semantics<parallel>, #tpu.dimension_semantics<parallel>, #tpu.dimension_semantics<arbitrary>], iteration_bounds = array<i64: 2, 1, 1>, scalar_prefetch = 0 : i64, scratch_operands = 1 : i64, tpu.core_type = #tpu.core_type<tc>, window_params = [{transform_indices = @transform_0, window_bounds = array<i64: 1, 18, 16, 192>}, {transform_indices = @transform_1, window_bounds = array<i64: 3, 192, 16>}, {transform_indices = @transform_2, window_bounds = array<i64: 1, 16>}, {transform_indices = @transform_3, window_bounds = array<i64: 1, 16>}, {transform_indices = @transform_4, window_bounds = array<i64: 1, 16, 16, 16>}]} {
    %c0_i32 = arith.constant 0 : i32
    %0 = arith.cmpi eq, %arg2, %c0_i32 : i32
    %1 = arith.extui %0 : i1 to i32
    %c0_i32_0 = arith.constant 0 : i32
    %2 = arith.cmpi ne, %1, %c0_i32_0 : i32
    scf.if %2 {
      %cst_27 = arith.constant 0.000000e+00 : f32
      %29 = vector.broadcast %cst_27 : f32 to vector<256x16xf32>
      %c0_28 = arith.constant 0 : index
      %c0_29 = arith.constant 0 : index
      %30 = vector.load %arg8[%c0_28, %c0_29] : memref<256x16xf32, #tpu.memory_space<vmem>>, vector<256x16xf32>
      tpu.vector_store %arg8[%c0_28, %c0_29], %29 {strides = array<i32>} : memref<256x16xf32, #tpu.memory_space<vmem>>, vector<256x16xf32>,
    } else {
    }
    %c0 = arith.constant 0 : index
    %c0_1 = arith.constant 0 : index
    %3 = vector.load %arg8[%c0, %c0_1] : memref<256x16xf32, #tpu.memory_space<vmem>>, vector<256x16xf32>
    %c0_2 = arith.constant 0 : index
    %c0_3 = arith.constant 0 : index
    %c0_4 = arith.constant 0 : index
    %c0_5 = arith.constant 0 : index
    %4 = vector.load %arg3[%c0_2, %c0_3, %c0_4, %c0_5] : memref<1x18x16x192xbf16, #tpu.memory_space<vmem>>, vector<1x16x16x192xbf16>
    %5 = vector.shape_cast %4 : vector<1x16x16x192xbf16> to vector<16x16x192xbf16>
    %6 = vector.shape_cast %5 : vector<16x16x192xbf16> to vector<256x192xbf16>
    %c0_6 = arith.constant 0 : index
    %c0_7 = arith.constant 0 : index
    %c0_8 = arith.constant 0 : index
    %7 = vector.load %arg4[%c0_6, %c0_7, %c0_8] : memref<3x192x16xbf16, #tpu.memory_space<vmem>>, vector<1x192x16xbf16>
    %8 = vector.shape_cast %7 : vector<1x192x16xbf16> to vector<192x16xbf16>
    %cst = arith.constant dense<0.000000e+00> : vector<256x16xf32>
    %9 = tpu.matmul %6, %8, %cst {dimension_numbers = #tpu.dot_dimension_numbers<[1], [0], [0], [1], [0, 0, 1, 1], [], []>} : vector<256x192xbf16>, vector<192x16xbf16>, vector<256x16xf32> -> vector<256x16xf32>
    %10 = arith.addf %3, %9 : vector<256x16xf32>
    %c0_9 = arith.constant 0 : index
    %c1 = arith.constant 1 : index
    %c0_10 = arith.constant 0 : index
    %c0_11 = arith.constant 0 : index
    %11 = vector.load %arg3[%c0_9, %c1, %c0_10, %c0_11] : memref<1x18x16x192xbf16, #tpu.memory_space<vmem>>, vector<1x16x16x192xbf16>
    %12 = vector.shape_cast %11 : vector<1x16x16x192xbf16> to vector<16x16x192xbf16>
    %13 = vector.shape_cast %12 : vector<16x16x192xbf16> to vector<256x192xbf16>
    %c1_12 = arith.constant 1 : index
    %c0_13 = arith.constant 0 : index
    %c0_14 = arith.constant 0 : index
    %14 = vector.load %arg4[%c1_12, %c0_13, %c0_14] : memref<3x192x16xbf16, #tpu.memory_space<vmem>>, vector<1x192x16xbf16>
    %15 = vector.shape_cast %14 : vector<1x192x16xbf16> to vector<192x16xbf16>
    %cst_15 = arith.constant dense<0.000000e+00> : vector<256x16xf32>
    %16 = tpu.matmul %13, %15, %cst_15 {dimension_numbers = #tpu.dot_dimension_numbers<[1], [0], [0], [1], [0, 0, 1, 1], [], []>} : vector<256x192xbf16>, vector<192x16xbf16>, vector<256x16xf32> -> vector<256x16xf32>
    %17 = arith.addf %10, %16 : vector<256x16xf32>
    %c0_16 = arith.constant 0 : index
    %c2 = arith.constant 2 : index
    %c0_17 = arith.constant 0 : index
    %c0_18 = arith.constant 0 : index
    %18 = vector.load %arg3[%c0_16, %c2, %c0_17, %c0_18] : memref<1x18x16x192xbf16, #tpu.memory_space<vmem>>, vector<1x16x16x192xbf16>
    %19 = vector.shape_cast %18 : vector<1x16x16x192xbf16> to vector<16x16x192xbf16>
    %20 = vector.shape_cast %19 : vector<16x16x192xbf16> to vector<256x192xbf16>
    %c2_19 = arith.constant 2 : index
    %c0_20 = arith.constant 0 : index
    %c0_21 = arith.constant 0 : index
    %21 = vector.load %arg4[%c2_19, %c0_20, %c0_21] : memref<3x192x16xbf16, #tpu.memory_space<vmem>>, vector<1x192x16xbf16>
    %22 = vector.shape_cast %21 : vector<1x192x16xbf16> to vector<192x16xbf16>
    %cst_22 = arith.constant dense<0.000000e+00> : vector<256x16xf32>
    %23 = tpu.matmul %20, %22, %cst_22 {dimension_numbers = #tpu.dot_dimension_numbers<[1], [0], [0], [1], [0, 0, 1, 1], [], []>} : vector<256x192xbf16>, vector<192x16xbf16>, vector<256x16xf32> -> vector<256x16xf32>
    %24 = arith.addf %17, %23 : vector<256x16xf32>
    %c0_23 = arith.constant 0 : index
    %c0_24 = arith.constant 0 : index
    %25 = vector.load %arg8[%c0_23, %c0_24] : memref<256x16xf32, #tpu.memory_space<vmem>>, vector<256x16xf32>
    tpu.vector_store %arg8[%c0_23, %c0_24], %24 {strides = array<i32>} : memref<256x16xf32, #tpu.memory_space<vmem>>, vector<256x16xf32>,
    %c0_i32_25 = arith.constant 0 : i32
    %26 = arith.cmpi eq, %arg2, %c0_i32_25 : i32
    %27 = arith.extui %26 : i1 to i32
    %c0_i32_26 = arith.constant 0 : i32
    %28 = arith.cmpi ne, %27, %c0_i32_26 : i32
    scf.if %28 {
      %c0_27 = arith.constant 0 : index
      %c0_28 = arith.constant 0 : index
      %29 = vector.load %arg8[%c0_27, %c0_28] : memref<256x16xf32, #tpu.memory_space<vmem>>, vector<256x16xf32>
      %c0_29 = arith.constant 0 : index
      %c0_30 = arith.constant 0 : index
      %30 = vector.load %arg5[%c0_29, %c0_30] : memref<1x16xf32, #tpu.memory_space<vmem>>, vector<1x16xf32>
      %31 = vector.broadcast %30 : vector<1x16xf32> to vector<256x16xf32>
      %32 = arith.mulf %29, %31 : vector<256x16xf32>
      %c0_31 = arith.constant 0 : index
      %c0_32 = arith.constant 0 : index
      %33 = vector.load %arg6[%c0_31, %c0_32] : memref<1x16xf32, #tpu.memory_space<vmem>>, vector<1x16xf32>
      %34 = vector.broadcast %33 : vector<1x16xf32> to vector<256x16xf32>
      %35 = arith.addf %32, %34 : vector<256x16xf32>
      %cst_33 = arith.constant 0.000000e+00 : f32
      %36 = vector.broadcast %cst_33 : f32 to vector<256x16xf32>
      %37 = arith.maximumf %35, %36 : vector<256x16xf32>
      %38 = arith.truncf %37 : vector<256x16xf32> to vector<256x16xbf16>
      %39 = vector.shape_cast %38 : vector<256x16xbf16> to vector<1x16x16x16xbf16>
      %c0_34 = arith.constant 0 : index
      %c0_35 = arith.constant 0 : index
      %c0_36 = arith.constant 0 : index
      %c0_37 = arith.constant 0 : index
      %40 = vector.load %arg7[%c0_34, %c0_35, %c0_36, %c0_37] : memref<1x16x16x16xbf16, #tpu.memory_space<vmem>>, vector<1x16x16x16xbf16>
      tpu.vector_store %arg7[%c0_34, %c0_35, %c0_36, %c0_37], %39 {strides = array<i32>} : memref<1x16x16x16xbf16, #tpu.memory_space<vmem>>, vector<1x16x16x16xbf16>,
    } else {
    }
    return
  }
  func.func @transform_0(%arg0: i32, %arg1: i32, %arg2: i32) -> (i32, i32, i32, i32) {
    %c0_i32 = arith.constant 0 : i32
    %c0_i32_0 = arith.constant 0 : i32
    %c0_i32_1 = arith.constant 0 : i32
    return %arg0, %c0_i32, %c0_i32_0, %arg2 : i32, i32, i32, i32
  }
  func.func @transform_1(%arg0: i32, %arg1: i32, %arg2: i32) -> (i32, i32, i32) {
    %c0_i32 = arith.constant 0 : i32
    %c0_i32_0 = arith.constant 0 : i32
    return %c0_i32, %arg2, %arg1 : i32, i32, i32
  }
  func.func @transform_2(%arg0: i32, %arg1: i32, %arg2: i32) -> (i32, i32) {
    %c0_i32 = arith.constant 0 : i32
    %c0_i32_0 = arith.constant 0 : i32
    return %c0_i32, %arg1 : i32, i32
  }
  func.func @transform_3(%arg0: i32, %arg1: i32, %arg2: i32) -> (i32, i32) {
    %c0_i32 = arith.constant 0 : i32
    %c0_i32_0 = arith.constant 0 : i32
    return %c0_i32, %arg1 : i32, i32
  }
  func.func @transform_4(%arg0: i32, %arg1: i32, %arg2: i32) -> (i32, i32, i32, i32) {
    %c0_i32 = arith.constant 0 : i32
    %c0_i32_0 = arith.constant 0 : i32
    %c0_i32_1 = arith.constant 0 : i32
    return %arg0, %c0_i32, %c0_i32_0, %arg1 : i32, i32, i32, i32
  }
}

</mosaic_0001>

<bundles_post_ra>
// kernel: tpu_custom_call.1
= control target key start
LH: loop header
LB: loop body
LE: loop exit
PB: predicated region body
PF: predicated region fallthrough
CT: control target
= control target key end

     0   :  { %9 = vsyncpa [#allocation4], 0  ;;  %s4007_s0 = inlined_call_operand.hbm [shape: bf16[2,18,16,192], index: 0, kind: input, shape index: {}]   ;;  %s4008_s1 = inlined_call_operand.vmem [shape: bf16[3,192,16], index: 1, kind: input, shape index: {}]   ;;  %s4009_s2 = inlined_call_operand.vmem [shape: f32[1,16], index: 2, kind: input, shape index: {}]   ;;  %s4010_s3 = inlined_call_operand.vmem [shape: f32[1,16], index: 3, kind: input, shape index: {}]   ;;  %s4011_s4 = inlined_call_operand.hbm [shape: bf16[2,16,16,16], index: 4, kind: output, shape index: {}]  }
   0x1   :  { %11 = vsyncpa [#allocation4 + $0x1], 0 }
   0x2   :  { %12 = vsyncpa [#allocation5], 0 }
   0x3   :  { %14 = vsyncpa [#allocation5 + $0x1], 0  ;;  %s3236_s15 = smov 0   ;;  %s3238_s16 = smov 0  }
   0x4   :  { %s3240_s17 = smov 0   ;;  %s3242_s18 = smov 0  }
   0x5   :  { %s3244_s19 = smov 0   ;;  %s3246_s20 = smov 0  }
   0x6 LB: > { %s2402_s21 = sadd.s32 4294967295, %s3201_s20   ;;  %s2403_s22 = sadd.s32 4294967294, %s3201_s20   ;;  %s3201_s20 = sphi %s3246_s20, %s20_s20   ;;  %s3197_s19 = sphi %s3244_s19, %s4026_s19   ;;  %s3193_s18 = sphi %s3242_s18, %s4025_s18   ;;  %s3189_s17 = sphi %s3240_s17, %s4024_s17   ;;  %s3185_s16 = sphi %s3238_s16, %s4023_s16   ;;  %s3181_s15 = sphi %s3236_s15, %s4022_s15  }
   0x7   : > { %s39_s23 = sadd.s32 1, %s3197_s19  ;;  %s48_s24 = sadd.s32 1, %s3189_s17 }
   0x8   : > { %p41_p0 = scmp.ge.s32.totalorder %s39_s23, 2  ;;  %p55_p1 = scmp.ne.s32.totalorder %s3189_s17, %s3185_s16 }
   0x9   : > { %p56_p2 = scmp.eq.s32.totalorder %s3201_s20, 0  ;;  %p61_p3 = scmp.ne.s32.totalorder %s3185_s16, %s3181_s15 }
   0xa   : > { %s4028_s23 = smov (%p41_p0, %s39_s23), 0  ;;  %p62_p5 = scmp.eq.s32.totalorder %s2402_s21, 0 }
   0xb   : > { %p3277_p4 = por %p56_p2, %p55_p1  ;;  %s43_s26 = ssub.s32 %s3197_s19, %s4028_s23 }
   0xc   : > { %p167_p6 = scmp.eq.s32.totalorder %s2402_s21, 1  ;;  %p46_p7 = scmp.eq.s32.totalorder %s43_s26, 0 }
   0xd   : > { %p3283_p8 = por %p62_p5, %p61_p3  ;;  %p173_p10 = scmp.eq.s32.totalorder %s2403_s22, 1 }
   0xe   : > { %p3287_p9 = por %p167_p6, %p55_p1  ;;  %p2943_p13 = scmp.lt.s32.totalorder %s3201_s20, 2 }
   0xf   : > { %s3292_s29 = scalar_select %p46_p7, %s3189_s17, %s48_s24  }
  0x10   : > { %s4015_s28 = scalar_select %p3287_p9, 1, 0 }
  0x11   : > { %p3294_p11 = por %p173_p10, %p61_p3  ;;  %s217_s5 = sand.u32 1, %s3189_s17  }
  0x12   : > { %s2928_s6 = smul.u32 288, %s217_s5  ;;  %p3304_p0 = pnand %p2943_p13, %p3277_p4 }
  0x13   : > { %s4016_s30 = scalar_select %p3294_p11, 1, 0 }
  0x14   : > { %s2929_s7 = smul.u32 4608, %s3197_s19  ;;  %s221_s12 = scalar_lea.vmem [#allocation3], %s2928_s6 }
  0x15   : > { %s230_s13 = sshll.u32 %s221_s12, 4  ;;  %s3316_s14 = scalar_lea.sflag [#allocation4], %s217_s5  ;;  %s3313_s13 = int_to_ptr.vmem [resolvable:$true] %s230_s13 }
  0x16   : > { %s3311_s11 = scalar_lea.hbm %s4007_s0, %s2929_s7  ;;  %p3091_p3 = pneg %p3304_p0 }
  0x17   : > { %s3089_s21 = scalar_lea.hbm %s3311_s11, 4608  ;;  %s3094_s25 = scalar_lea.hbm %s4007_s0, 9216 }
  0x18   : > { %p3090_p2 = scmp.ne.s32.totalorder %s3311_s11, %s3089_s21  ;;  %p3095_p6 = scmp.lt.u32.totalorder %s3311_s11, %s4007_s0 }
  0x19   : > { %p3096_p7 = scmp.lt.u32.totalorder %s3094_s25, %s3089_s21  ;;  %p3098_p13 = scmp.lt.u32.totalorder %s3089_s21, %s3311_s11 }
  0x1a   : > { %p3092_p4 = pnand %p3091_p3, %p3090_p2 }
  0x1b   : > { %p3097_p10 = por %p3096_p7, %p3095_p6 }
  0x1c   : > { %p3093_p5 = pneg %p3092_p4 }
  0x1d   : > { %p3099_p12 = por %p3098_p13, %p3097_p10 }
  0x1f   : > { %p3100_p1 = pnand %p3099_p12, %p3093_p5 }
  0x21   : > { %3103 = shalt.err (!%p3100_p1)
}
  0x22   : > { %s3104_s5 = scalar_lea.vmem %s3313_s13, 4608  ;;  %s3203_s7 = smov [#allocation3]  }
  0x23   : > { %p3105_p2 = scmp.ne.s32.totalorder %s3313_s13, %s3104_s5  ;;  %s3109_s9 = sshll.u32 %s3203_s7, 4  ;;  %s3110_s9 = int_to_ptr.vmem [resolvable:$false] %s3109_s9 }
  0x24   : > { %s3111_s10 = scalar_lea.vmem %s3110_s9, 9216  ;;  %p3112_p9 = scmp.lt.s32.totalorder %s3313_s13, %s3110_s9 }
  0x25   : > { %p3107_p4 = pnand %p3105_p2, %p3091_p3  ;;  %p3113_p6 = scmp.lt.s32.totalorder %s3111_s10, %s3104_s5 }
  0x27   : > { %p3108_p11 = pneg %p3107_p4  ;;  %p3114_p7 = por %p3113_p6, %p3112_p9 }
  0x29   : > { %p3115_p10 = pnand %p3114_p7, %p3108_p11 }
  0x2b   : > { %3118 = shalt.err (!%p3115_p10)
}
  0x2c   : > { %s3204_s12 = smov 128   ;;  %s3205_s21 = smov 8  }
  0x2d   : > { %2938 = dma.hbm_to_vmem [thread:$0]  (!%p3304_p0), %s3311_s11, 4608, %s3313_s13, %s3316_s14, %s3204_s12, %s3204_s12, %s3205_s21  }
  0x2e   : > { %p238_p12 = scmp.lt.s32.totalorder %s3201_s20, 3  ;;  %p4018_p1 = scmp.ge.s32.totalorder %s3201_s20, 1 }
  0x30   : > { %p239_p3 = pnand %p4018_p1, %p238_p12 }
  0x31   : > { %s3348_s22 = sand.u32 (!%p239_p3), 1, %s3185_s16  }
  0x32   : > { %242 = sbr.rel (%p239_p3) target bundleno = 540 (0x21c), region = 36  ;;  %s245_s25 = scalar_lea.sflag (!%p239_p3), [#allocation4], %s3348_s22 }
  0x33   : > { %s2930_s24 = smul.u32 (!%p239_p3), 288, %s3348_s22 }
  0x35   : > { %s3352_s26 = scalar_lea.vmem (!%p239_p3), [#allocation3], %s2930_s24 }
  0x39   : > { %3172 = dma.done.wait (%p3283_p8), %s245_s25, 4608  }
  0x3a   : > { %3174 = vsyncadd (%p3283_p8), %s245_s25, 4294962688  ;;  %v3206_v0 = vmov 0   ;;  %v2999_v1 = vld [vmem:[%s4008_s1] sm:$0xff]   ;;  %v3001_v3 = vld [vmem:[%s4008_s1 + $0x8] sm:$0xff]   ;;  %vm645_vm0 = vcmask 523264   ;;  %vm308_vm1 = vcmask 130048  }
  0x3b   : > { %694 = vmatprep.subr.bf16.mxu1 %v3206_v0  ;;  %1209 = vmatprep.subr.bf16.mxu0 %v3206_v0  ;;  %v3366_v2 = vld [vmem:[%s4008_s1 + $0x60] sm:$0xff]   ;;  %v3376_v4 = vld [vmem:[%s4008_s1 + $0x68] sm:$0xff]   ;;  %v3003_v5 = vld [vmem:[%s4008_s1 + $0x10] sm:$0xff]   ;;  %v3207_v55 = vmov 0.0   ;;  %s2411_s5 = sshll.u32 %s3348_s22, 7  ;;  %vm2223_vm2 = vcmask 125952  }
  0x3c   : > { %695 = vmatpush1.bf16.msra.mxu1 %v2999_v1  ;;  %1210 = vmatpush1.bf16.msra.mxu0 %v3366_v2  ;;  %v3387_v6 = vld [vmem:[%s4008_s1 + $0x70] sm:$0xff]   ;;  %v3005_v7 = vld [vmem:[%s4008_s1 + $0x18] sm:$0xff]   ;;  %v3007_v9 = vld [vmem:[%s4008_s1 + $0x20] sm:$0xff]   ;;  %309 = vst.msk [vmem:[#allocation2] sm:$0xff] %vm308_vm1, %v3207_v55  ;;  %s3787_s27 = scalar_lea.vmem [#allocation6], %s2411_s5  ;;  %s2775_s7 = sshll.u32 %s3193_s18, 11 }
  0x3d   : > { %696 = vmatprep.subr.bf16.mxu1 %v3206_v0  ;;  %1211 = vmatprep.subr.bf16.mxu0 %v3206_v0  ;;  %v3398_v8 = vld [vmem:[%s4008_s1 + $0x78] sm:$0xff]   ;;  %v3409_v10 = vld [vmem:[%s4008_s1 + $0x80] sm:$0xff]   ;;  %v3009_v11 = vld [vmem:[%s4008_s1 + $0x28] sm:$0xff]   ;;  %310 = vst.msk [vmem:[#allocation2 + $0x8] sm:$0xff] %vm308_vm1, %v3207_v55  ;;  %s2271_s9 = sshll.u32 %s3787_s27, 4  ;;  %s3952_s21 = scalar_lea.hbm %s4011_s4, %s2775_s7  ;;  %s3954_s9 = int_to_ptr.vmem [resolvable:$true] %s2271_s9 }
  0x3e   : > { %v3420_v12 = vld [vmem:[%s4008_s1 + $0x88] sm:$0xff]   ;;  %v3011_v13 = vld [vmem:[%s4008_s1 + $0x30] sm:$0xff]   ;;  %v3013_v16 = vld [vmem:[%s4008_s1 + $0x38] sm:$0xff]   ;;  %311 = vst.msk [vmem:[#allocation2 + $0x10] sm:$0xff] %vm308_vm1, %v3207_v55  ;;  %s2257_s24 = scalar_lea.sflag [#allocation5], %s3348_s22  ;;  %s3119_s18 = scalar_lea.vmem %s3954_s9, 2048 }
  0x3f   : > { %v3431_v14 = vld [vmem:[%s4008_s1 + $0x90] sm:$0xff]   ;;  %v3025_v15 = vld [vmem:[%s3352_s26 + $0x4] ss:$8 sps:$4 sm:$0xff]   ;;  %v3444_v18 = vld [vmem:[%s4008_s1 + $0x98] sm:$0xff]   ;;  %312 = vst.msk [vmem:[#allocation2 + $0x18] sm:$0xff] %vm308_vm1, %v3207_v55  ;;  %p3120_p8 = scmp.ne.s32.totalorder %s3954_s9, %s3119_s18  ;;  %p4019_p9 = scmp.ne.s32.totalorder %s4015_s28, 0 }
  0x40   : > { %697 = vmatpush1.bf16.msra.mxu1 %v3001_v3  ;;  %1212 = vmatpush1.bf16.msra.mxu0 %v3376_v4  ;;  %v3028_v17 = vld [vmem:[%s3352_s26 + $0x14] ss:$8 sps:$4 sm:$0xff]   ;;  %v3015_v19 = vld [vmem:[%s4008_s1 + $0x40] sm:$0xff]   ;;  %v3017_v21 = vld [vmem:[%s4008_s1 + $0x48] sm:$0xff]   ;;  %313 = vst.msk [vmem:[#allocation2 + $0x20] sm:$0xff] %vm308_vm1, %v3207_v55  ;;  %s3208_s25 = smov [#allocation6]  }
  0x41   : > { %698 = vmatprep.subr.bf16.mxu1 %v3206_v0  ;;  %1213 = vmatprep.subr.bf16.mxu0 %v3206_v0  ;;  %v3457_v20 = vld [vmem:[%s4008_s1 + $0xa0] sm:$0xff]   ;;  %v3468_v22 = vld [vmem:[%s4008_s1 + $0xa8] sm:$0xff]   ;;  %v3019_v23 = vld [vmem:[%s4008_s1 + $0x50] sm:$0xff]   ;;  %314 = vst.msk [vmem:[#allocation2 + $0x28] sm:$0xff] %vm308_vm1, %v3207_v55  ;;  %p3121_p11 = pnand %p3120_p8, %p4019_p9  ;;  %s3123_s8 = sshll.u32 %s3208_s25, 4  ;;  %s3124_s8 = int_to_ptr.vmem [resolvable:$false] %s3123_s8 }
  0x42   : > { %2456 = vmatprep.mubr.msk.bf16.mxu1 %vm645_vm0, %v3025_v15  ;;  %2572 = vmatprep.mubr.msk.bf16.mxu0 %vm645_vm0, %v3028_v17  ;;  %v3479_v24 = vld [vmem:[%s4008_s1 + $0xb0] sm:$0xff]   ;;  %v3021_v25 = vld [vmem:[%s4008_s1 + $0x58] sm:$0xff]   ;;  %v3023_v27 = vld [vmem:[%s3352_s26] ss:$8 sps:$4 sm:$0xff]   ;;  %315 = vst.msk [vmem:[#allocation2 + $0x30] sm:$0xff] %vm308_vm1, %v3207_v55  ;;  %s3125_s11 = scalar_lea.vmem %s3124_s8, 4096  ;;  %p3126_p5 = scmp.lt.s32.totalorder %s3954_s9, %s3124_s8 }
  0x43   : > { %v3490_v26 = vld [vmem:[%s4008_s1 + $0xb8] sm:$0xff]   ;;  %v3029_v29 = vld [vmem:[%s4008_s1 + $0xc0] sm:$0xff]   ;;  %v3033_v31 = vld [vmem:[%s4008_s1 + $0xc8] sm:$0xff]   ;;  %316 = vst.msk [vmem:[#allocation2 + $0x38] sm:$0xff] %vm308_vm1, %v3207_v55  ;;  %p3122_p0 = pneg %p3121_p11  ;;  %p3127_p13 = scmp.lt.s32.totalorder %s3125_s11, %s3119_s18 }
  0x44   : > { %699 = vmatpush1.bf16.msra.mxu1 %v3003_v5  ;;  %1214 = vmatpush1.bf16.msra.mxu0 %v3387_v6  ;;  %v3026_v28 = vld [vmem:[%s3352_s26 + $0x10] ss:$8 sps:$4 sm:$0xff]   ;;  %v3502_v30 = vld [vmem:[%s3352_s26 + $0x24] ss:$8 sps:$4 sm:$0xff]   ;;  %v3514_v32 = vld [vmem:[%s3352_s26 + $0x20] ss:$8 sps:$4 sm:$0xff]  }
  0x45   : > { %700 = vmatprep.subr.bf16.mxu1 %v3206_v0  ;;  %1215 = vmatprep.subr.bf16.mxu0 %v3206_v0  ;;  %v3034_v33 = vld [vmem:[%s4008_s1 + $0xd0] sm:$0xff]   ;;  %v3038_v35 = vld [vmem:[%s4008_s1 + $0xd8] sm:$0xff]   ;;  %v3540_v37 = vld [vmem:[%s3352_s26 + $0x44] ss:$8 sps:$4 sm:$0xff]   ;;  %317 = vst.msk [vmem:[#allocation2 + $0x40] sm:$0xff] %vm308_vm1, %v3207_v55  ;;  %p3128_p2 = por %p3127_p13, %p3126_p5 }
  0x46   : > { %v3521_v34 = vld [vmem:[%s3352_s26 + $0x34] ss:$8 sps:$4 sm:$0xff]   ;;  %v3537_v36 = vld [vmem:[%s3352_s26 + $0x30] ss:$8 sps:$4 sm:$0xff]   ;;  %v3042_v38 = vld [vmem:[%s4008_s1 + $0xe0] sm:$0xff]   ;;  %318 = vst.msk [vmem:[#allocation2 + $0x48] sm:$0xff] %vm308_vm1, %v3207_v55 }
  0x47   : > { %v3043_v39 = vld [vmem:[%s4008_s1 + $0xe8] sm:$0xff]   ;;  %v3564_v41 = vld [vmem:[%s3352_s26 + $0x54] ss:$8 sps:$4 sm:$0xff]   ;;  %v3585_v44 = vld [vmem:[%s3352_s26 + $0x50] ss:$8 sps:$4 sm:$0xff]   ;;  %319 = vst.msk [vmem:[#allocation2 + $0x50] sm:$0xff] %vm308_vm1, %v3207_v55  ;;  %p3129_p4 = pnand %p3128_p2, %p3122_p0 }
  0x48   : > { %701 = vmatpush1.bf16.msra.mxu1 %v3005_v7  ;;  %1216 = vmatpush1.bf16.msra.mxu0 %v3398_v8  ;;  %v3561_v40 = vld [vmem:[%s3352_s26 + $0x40] ss:$8 sps:$4 sm:$0xff]   ;;  %v3047_v42 = vld [vmem:[%s4008_s1 + $0xf0] sm:$0xff]   ;;  %v3051_v43 = vld [vmem:[%s4008_s1 + $0xf8] sm:$0xff]   ;;  %320 = vst.msk [vmem:[#allocation2 + $0x58] sm:$0xff] %vm308_vm1, %v3207_v55 }
  0x49   : > { %702 = vmatprep.subr.bf16.mxu1 %v3206_v0  ;;  %1217 = vmatprep.subr.bf16.mxu0 %v3206_v0  ;;  %v3588_v45 = vld [vmem:[%s3352_s26 + $0x64] ss:$8 sps:$4 sm:$0xff]   ;;  %v3609_v48 = vld [vmem:[%s3352_s26 + $0x60] ss:$8 sps:$4 sm:$0xff]   ;;  %v3612_v49 = vld [vmem:[%s3352_s26 + $0x74] ss:$8 sps:$4 sm:$0xff]  }
  0x4a   : > { %v3052_v46 = vld [vmem:[%s4008_s1 + $0x100] sm:$0xff]   ;;  %v3056_v47 = vld [vmem:[%s4008_s1 + $0x108] sm:$0xff]   ;;  %v3060_v50 = vld [vmem:[%s4008_s1 + $0x110] sm:$0xff]   ;;  %321 = vst.msk [vmem:[#allocation2 + $0x60] sm:$0xff] %vm308_vm1, %v3207_v55 }
  0x4b   : > { %v3061_v51 = vld [vmem:[%s4008_s1 + $0x118] sm:$0xff]   ;;  %v3636_v53 = vld [vmem:[%s3352_s26 + $0x84] ss:$8 sps:$4 sm:$0xff]   ;;  %v3646_v54 = vld [vmem:[%s3352_s26 + $0x80] ss:$8 sps:$4 sm:$0xff]   ;;  %322 = vst.msk [vmem:[#allocation2 + $0x68] sm:$0xff] %vm308_vm1, %v3207_v55 }
  0x4c   : > { %703 = vmatpush1.bf16.msra.mxu1 %v3007_v9  ;;  %1218 = vmatpush1.bf16.msra.mxu0 %v3409_v10  ;;  %v3633_v52 = vld [vmem:[%s3352_s26 + $0x70] ss:$8 sps:$4 sm:$0xff]   ;;  %323 = vst.msk [vmem:[#allocation2 + $0x70] sm:$0xff] %vm308_vm1, %v3207_v55  ;;  %324 = vst.msk [vmem:[#allocation2 + $0x78] sm:$0xff] %vm308_vm1, %v3207_v55  ;;  %v3062_v56 = vld [vmem:[%s3352_s26 + $0x94] ss:$8 sps:$4 sm:$0xff]  }
  0x4d   : > { %704 = vmatprep.subr.bf16.mxu1 %v3206_v0  ;;  %1219 = vmatprep.subr.bf16.mxu0 %v3206_v0  ;;  %325 = vst.msk [vmem:[#allocation2 + $0x80] sm:$0xff] %vm308_vm1, %v3207_v55  ;;  %326 = vst.msk [vmem:[#allocation2 + $0x88] sm:$0xff] %vm308_vm1, %v3207_v55  ;;  %v3064_v57 = vld [vmem:[%s3352_s26 + $0x90] ss:$8 sps:$4 sm:$0xff]   ;;  %v3065_v58 = vld [vmem:[%s3352_s26 + $0xa4] ss:$8 sps:$4 sm:$0xff]  }
  0x4e   : > { %327 = vst.msk [vmem:[#allocation2 + $0x90] sm:$0xff] %vm308_vm1, %v3207_v55  ;;  %328 = vst.msk [vmem:[#allocation2 + $0x98] sm:$0xff] %vm308_vm1, %v3207_v55  ;;  %v3067_v59 = vld [vmem:[%s3352_s26 + $0xa0] ss:$8 sps:$4 sm:$0xff]   ;;  %v3068_v60 = vld [vmem:[%s3352_s26 + $0xb4] ss:$8 sps:$4 sm:$0xff]  }
  0x4f   : > { %329 = vst.msk [vmem:[#allocation2 + $0xa0] sm:$0xff] %vm308_vm1, %v3207_v55  ;;  %330 = vst.msk [vmem:[#allocation2 + $0xa8] sm:$0xff] %vm308_vm1, %v3207_v55  ;;  %v3070_v61 = vld [vmem:[%s3352_s26 + $0xb0] ss:$8 sps:$4 sm:$0xff]   ;;  %v3071_v62 = vld [vmem:[%s3352_s26 + $0xc4] ss:$8 sps:$4 sm:$0xff]  }
  0x50   : > { %705 = vmatpush1.bf16.msra.mxu1 %v3009_v11  ;;  %1220 = vmatpush1.bf16.msra.mxu0 %v3420_v12  ;;  %331 = vst.msk [vmem:[#allocation2 + $0xb0] sm:$0xff] %vm308_vm1, %v3207_v55  ;;  %332 = vst.msk [vmem:[#allocation2 + $0xb8] sm:$0xff] %vm308_vm1, %v3207_v55  ;;  %v3073_v63 = vld [vmem:[%s3352_s26 + $0xc0] ss:$8 sps:$4 sm:$0xff]   ;;  %v3076_v1 = vld [vmem:[%s3352_s26 + $0xd0] ss:$8 sps:$4 sm:$0xff]  }
  0x51   : > { %706 = vmatprep.subr.bf16.mxu1 %v3206_v0  ;;  %1221 = vmatprep.subr.bf16.mxu0 %v3206_v0  ;;  %333 = vst.msk [vmem:[#allocation2 + $0xc0] sm:$0xff] %vm308_vm1, %v3207_v55  ;;  %334 = vst.msk [vmem:[#allocation2 + $0xc8] sm:$0xff] %vm308_vm1, %v3207_v55  ;;  %v3079_v3 = vld [vmem:[%s3352_s26 + $0xe0] ss:$8 sps:$4 sm:$0xff]   ;;  %v3082_v5 = vld [vmem:[%s3352_s26 + $0xf0] ss:$8 sps:$4 sm:$0xff]  }
  0x52   : > { %335 = vst.msk [vmem:[#allocation2 + $0xd0] sm:$0xff] %vm308_vm1, %v3207_v55  ;;  %336 = vst.msk [vmem:[#allocation2 + $0xd8] sm:$0xff] %vm308_vm1, %v3207_v55  ;;  %v3085_v7 = vld [vmem:[%s3352_s26 + $0x100] ss:$8 sps:$4 sm:$0xff]   ;;  %v3088_v9 = vld [vmem:[%s3352_s26 + $0x110] ss:$8 sps:$4 sm:$0xff]  }
  0x53   : > { %337 = vst.msk [vmem:[#allocation2 + $0xe0] sm:$0xff] %vm308_vm1, %v3207_v55  ;;  %338 = vst.msk [vmem:[#allocation2 + $0xe8] sm:$0xff] %vm308_vm1, %v3207_v55 }
  0x54   : > { %707 = vmatpush1.bf16.msra.mxu1 %v3011_v13  ;;  %1222 = vmatpush1.bf16.msra.mxu0 %v3431_v14  ;;  %339 = vst.msk [vmem:[#allocation2 + $0xf0] sm:$0xff] %vm308_vm1, %v3207_v55  ;;  %340 = vst.msk [vmem:[#allocation2 + $0xf8] sm:$0xff] %vm308_vm1, %v3207_v55  ;;  %v3773_v55 = vld [vmem:[%s4009_s2] ss:$0 sm:$0xff] }
  0x55   : > { %708 = vmatprep.subr.bf16.mxu1 %v3206_v0  ;;  %1223 = vmatprep.subr.bf16.mxu0 %v3206_v0 }
  0x58   : > { %709 = vmatpush1.bf16.msra.mxu1 %v3013_v16  ;;  %1224 = vmatpush1.bf16.msra.mxu0 %v3444_v18 }
  0x59   : > { %710 = vmatprep.subr.bf16.mxu1 %v3206_v0  ;;  %1225 = vmatprep.subr.bf16.mxu0 %v3206_v0 }
  0x5c   : > { %711 = vmatpush1.bf16.msra.mxu1 %v3015_v19  ;;  %1226 = vmatpush1.bf16.msra.mxu0 %v3457_v20 }
  0x5d   : > { %712 = vmatprep.subr.bf16.mxu1 %v3206_v0  ;;  %1227 = vmatprep.subr.bf16.mxu0 %v3206_v0 }
  0x60   : > { %713 = vmatpush1.bf16.msra.mxu1 %v3017_v21  ;;  %1228 = vmatpush1.bf16.msra.mxu0 %v3468_v22 }
  0x61   : > { %714 = vmatprep.subr.bf16.mxu1 %v3206_v0  ;;  %1229 = vmatprep.subr.bf16.mxu0 %v3206_v0 }
  0x64   : > { %715 = vmatpush1.bf16.msra.mxu1 %v3019_v23  ;;  %1230 = vmatpush1.bf16.msra.mxu0 %v3479_v24 }
  0x65   : > { %716 = vmatprep.subr.bf16.mxu1 %v3206_v0  ;;  %1231 = vmatprep.subr.bf16.mxu0 %v3206_v0 }
  0x68   : > { %717 = vmatpush1.bf16.msra.mxu1 %v3021_v25  ;;  %1232 = vmatpush1.bf16.msra.mxu0 %v3490_v26 }
  0x69   : > { %2776 = vmatprep.subr.bf16.mxu1 %v3206_v0  ;;  %1724 = vmatprep.subr.bf16.mxu0 %v3206_v0 }
  0x6b   : > { %727 = vmatmul.mubr.bf16.vlgmr.msra.gmra.mrb[0].mxu1 %v3023_v27  ;;  %1242 = vmatmul.mubr.bf16.vlgmr.msra.gmra.mrb[0].mxu0 %v3026_v28 }
  0x6c   : > { %2788 = vmatpush1.bf16.msra.mxu1 %v3366_v2  ;;  %1725 = vmatpush1.bf16.msra.mxu0 %v3029_v29  ;;  %v3077_v2 = vld [vmem:[%s3352_s26 + $0xe4] ss:$8 sps:$4 sm:$0xff]  }
  0x6d   : > { %2457 = vmatprep.mubr.msk.bf16.mxu1 %vm645_vm0, %v3028_v17  ;;  %2573 = vmatprep.mubr.msk.bf16.mxu0 %vm645_vm0, %v3502_v30 }
  0x6e   : > { %1726 = vmatprep.subr.bf16.mxu0 %v3206_v0  ;;  %2777 = vmatprep.subr.bf16.mxu1 %v3206_v0 }
  0x70   : > { %2789 = vmatpush1.bf16.msra.mxu1 %v3376_v4  ;;  %1727 = vmatpush1.bf16.msra.mxu0 %v3033_v31  ;;  %v3080_v4 = vld [vmem:[%s3352_s26 + $0xf4] ss:$8 sps:$4 sm:$0xff]  }
  0x71   : > { %2778 = vmatprep.subr.bf16.mxu1 %v3206_v0  ;;  %1728 = vmatprep.subr.bf16.mxu0 %v3206_v0 }
  0x73   : > { %735 = vmatmul.mubr.bf16.gmra.mrb[4].mxu1 %v3026_v28  ;;  %1250 = vmatmul.mubr.bf16.gmra.mrb[4].mxu0 %v3514_v32 }
  0x74   : > { %2458 = vmatprep.mubr.msk.bf16.mxu1 %vm645_vm0, %v3502_v30  ;;  %1729 = vmatpush1.bf16.msra.mxu0 %v3034_v33 }
  0x75   : > { %2574 = vmatprep.mubr.msk.bf16.mxu0 %vm645_vm0, %v3521_v34  ;;  %1730 = vmatprep.subr.bf16.mxu0 %v3206_v0 }
  0x76   : > { %2790 = vmatpush1.bf16.msra.mxu1 %v3387_v6  ;;  %v3083_v6 = vld [vmem:[%s3352_s26 + $0x104] ss:$8 sps:$4 sm:$0xff]  }
  0x77   : > { %2779 = vmatprep.subr.bf16.mxu1 %v3206_v0 }
  0x78   : > { %1731 = vmatpush1.bf16.msra.mxu0 %v3038_v35 }
  0x79   : > { %1732 = vmatprep.subr.bf16.mxu0 %v3206_v0 }
  0x7a   : > { %2791 = vmatpush1.bf16.msra.mxu1 %v3398_v8  ;;  %v3086_v8 = vld [vmem:[%s3352_s26 + $0x114] ss:$8 sps:$4 sm:$0xff]  }
  0x7b   : > { %743 = vmatmul.mubr.bf16.gmra.mrb[8].mxu1 %v3514_v32  ;;  %2780 = vmatprep.subr.bf16.mxu1 %v3206_v0 }
  0x7c   : > { %1258 = vmatmul.mubr.bf16.gmra.mrb[8].mxu0 %v3537_v36  ;;  %2459 = vmatprep.mubr.msk.bf16.mxu1 %vm645_vm0, %v3521_v34 }
  0x7d   : > { %2575 = vmatprep.mubr.msk.bf16.mxu0 %vm645_vm0, %v3540_v37  ;;  %1733 = vmatpush1.bf16.msra.mxu0 %v3042_v38 }
  0x7e   : > { %1734 = vmatprep.subr.bf16.mxu0 %v3206_v0  ;;  %2792 = vmatpush1.bf16.msra.mxu1 %v3409_v10 }
  0x7f   : > { %2781 = vmatprep.subr.bf16.mxu1 %v3206_v0 }
  0x81   : > { %1735 = vmatpush1.bf16.msra.mxu0 %v3043_v39 }
  0x82   : > { %1736 = vmatprep.subr.bf16.mxu0 %v3206_v0  ;;  %2793 = vmatpush1.bf16.msra.mxu1 %v3420_v12 }
  0x83   : > { %751 = vmatmul.mubr.bf16.gmra.mrb[12].mxu1 %v3537_v36  ;;  %2782 = vmatprep.subr.bf16.mxu1 %v3206_v0 }
  0x84   : > { %1266 = vmatmul.mubr.bf16.gmra.mrb[12].mxu0 %v3561_v40  ;;  %2460 = vmatprep.mubr.msk.bf16.mxu1 %vm645_vm0, %v3540_v37 }
  0x85   : > { %2576 = vmatprep.mubr.msk.bf16.mxu0 %vm645_vm0, %v3564_v41  ;;  %1737 = vmatpush1.bf16.msra.mxu0 %v3047_v42  ;;  %v341_v42 = vld [vmem:[#allocation2] sm:$0xff] }
  0x86   : > { %1738 = vmatprep.subr.bf16.mxu0 %v3206_v0  ;;  %2794 = vmatpush1.bf16.msra.mxu1 %v3431_v14 }
  0x87   : > { %2783 = vmatprep.subr.bf16.mxu1 %v3206_v0 }
  0x89   : > { %1739 = vmatpush1.bf16.msra.mxu0 %v3051_v43  ;;  %v342_v43 = vld [vmem:[#allocation2 + $0x8] sm:$0xff] }
  0x8a   : > { %1740 = vmatprep.subr.bf16.mxu0 %v3206_v0  ;;  %2795 = vmatpush1.bf16.msra.mxu1 %v3444_v18 }
  0x8b   : > { %759 = vmatmul.mubr.bf16.gmra.mrb[16].mxu1 %v3561_v40  ;;  %2784 = vmatprep.subr.bf16.mxu1 %v3206_v0 }
  0x8c   : > { %1274 = vmatmul.mubr.bf16.gmra.mrb[16].mxu0 %v3585_v44  ;;  %2461 = vmatprep.mubr.msk.bf16.mxu1 %vm645_vm0, %v3564_v41 }
  0x8d   : > { %2577 = vmatprep.mubr.msk.bf16.mxu0 %vm645_vm0, %v3588_v45  ;;  %1741 = vmatpush1.bf16.msra.mxu0 %v3052_v46 }
  0x8e   : > { %1742 = vmatprep.subr.bf16.mxu0 %v3206_v0  ;;  %2796 = vmatpush1.bf16.msra.mxu1 %v3457_v20 }
  0x8f   : > { %2785 = vmatprep.subr.bf16.mxu1 %v3206_v0 }
  0x91   : > { %1743 = vmatpush1.bf16.msra.mxu0 %v3056_v47 }
  0x92   : > { %1744 = vmatprep.subr.bf16.mxu0 %v3206_v0  ;;  %2797 = vmatpush1.bf16.msra.mxu1 %v3468_v22 }
  0x93   : > { %767 = vmatmul.mubr.bf16.gmra.mrb[20].mxu1 %v3585_v44  ;;  %2786 = vmatprep.subr.bf16.mxu1 %v3206_v0 }
  0x94   : > { %1282 = vmatmul.mubr.bf16.gmra.mrb[20].mxu0 %v3609_v48  ;;  %2462 = vmatprep.mubr.msk.bf16.mxu1 %vm645_vm0, %v3588_v45 }
  0x95   : > { %2578 = vmatprep.mubr.msk.bf16.mxu0 %vm645_vm0, %v3612_v49  ;;  %1745 = vmatpush1.bf16.msra.mxu0 %v3060_v50 }
  0x96   : > { %1746 = vmatprep.subr.bf16.mxu0 %v3206_v0  ;;  %2798 = vmatpush1.bf16.msra.mxu1 %v3479_v24 }
  0x97   : > { %2787 = vmatprep.subr.bf16.mxu1 %v3206_v0  ;;  %v3074_v0 = vld [vmem:[%s3352_s26 + $0xd4] ss:$8 sps:$4 sm:$0xff]  }
  0x99   : > { %1747 = vmatpush1.bf16.msra.mxu0 %v3061_v51 }
  0x9a   : > { %2799 = vmatpush1.bf16.msra.mxu1 %v3490_v26 }
  0x9b   : > { %775 = vmatmul.mubr.bf16.gmra.mrb[24].mxu1 %v3609_v48 }
  0x9c   : > { %1290 = vmatmul.mubr.bf16.gmra.mrb[24].mxu0 %v3633_v52  ;;  %2463 = vmatprep.mubr.msk.bf16.mxu1 %vm645_vm0, %v3612_v49 }
  0x9d   : > { %2579 = vmatprep.mubr.msk.bf16.mxu0 %vm645_vm0, %v3636_v53 }
  0xa3   : > { %783 = vmatmul.mubr.bf16.gmra.mrb[28].mxu1 %v3633_v52 }
  0xa4   : > { %1298 = vmatmul.mubr.bf16.gmra.mrb[28].mxu0 %v3646_v54  ;;  %2464 = vmatprep.mubr.msk.bf16.mxu1 %vm645_vm0, %v3636_v53 }
  0xa5   : > { %2688 = vmatprep.mubr.msk.bf16.mxu0 %vm645_vm0, %v3502_v30 }
  0xab   : > { %791 = vmatmul.mubr.bf16.gmra.mrb[32].mxu1 %v3646_v54 }
  0xac   : > { %1757 = vmatmul.mubr.bf16.vlgmr.msra.gmra.mrb[0].mxu0 %v3514_v32  ;;  %2465 = vmatprep.mubr.msk.bf16.mxu1 %vm645_vm0, %v3062_v56 }
  0xad   : > { %2689 = vmatprep.mubr.msk.bf16.mxu0 %vm645_vm0, %v3521_v34 }
  0xb3   : > { %799 = vmatmul.mubr.bf16.gmra.mrb[36].mxu1 %v3064_v57 }
  0xb4   : > { %1765 = vmatmul.mubr.bf16.gmra.mrb[4].mxu0 %v3537_v36  ;;  %2466 = vmatprep.mubr.msk.bf16.mxu1 %vm645_vm0, %v3065_v58 }
  0xb5   : > { %2690 = vmatprep.mubr.msk.bf16.mxu0 %vm645_vm0, %v3540_v37 }
  0xbb   : > { %807 = vmatmul.mubr.bf16.gmra.mrb[40].mxu1 %v3067_v59 }
  0xbc   : > { %1773 = vmatmul.mubr.bf16.gmra.mrb[8].mxu0 %v3561_v40  ;;  %2467 = vmatprep.mubr.msk.bf16.mxu1 %vm645_vm0, %v3068_v60 }
  0xbd   : > { %2691 = vmatprep.mubr.msk.bf16.mxu0 %vm645_vm0, %v3564_v41 }
  0xc3   : > { %815 = vmatmul.mubr.bf16.gmra.mrb[44].mxu1 %v3070_v61 }
  0xc4   : > { %1781 = vmatmul.mubr.bf16.gmra.mrb[12].mxu0 %v3585_v44  ;;  %2468 = vmatprep.mubr.msk.bf16.mxu1 %vm645_vm0, %v3071_v62 }
  0xc5   : > { %2692 = vmatprep.mubr.msk.bf16.mxu0 %vm645_vm0, %v3588_v45 }
  0xcb   : > { %823 = vmatmul.mubr.bf16.gmra.mrb[48].mxu1 %v3073_v63 }
  0xcc   : > { %1789 = vmatmul.mubr.bf16.gmra.mrb[16].mxu0 %v3609_v48  ;;  %2469 = vmatprep.mubr.msk.bf16.mxu1 %vm645_vm0, %v3074_v0 }
  0xcd   : > { %2693 = vmatprep.mubr.msk.bf16.mxu0 %vm645_vm0, %v3612_v49 }
  0xd3   : > { %831 = vmatmul.mubr.bf16.gmra.mrb[52].mxu1 %v3076_v1 }
  0xd4   : > { %1797 = vmatmul.mubr.bf16.gmra.mrb[20].mxu0 %v3633_v52  ;;  %2470 = vmatprep.mubr.msk.bf16.mxu1 %vm645_vm0, %v3077_v2  ;;  %v343_v52 = vld [vmem:[#allocation2 + $0x10] sm:$0xff] }
  0xd5   : > { %2694 = vmatprep.mubr.msk.bf16.mxu0 %vm645_vm0, %v3636_v53  ;;  %v344_v53 = vld [vmem:[#allocation2 + $0x18] sm:$0xff] }
  0xdb   : > { %839 = vmatmul.mubr.bf16.gmra.mrb[56].mxu1 %v3079_v3 }
  0xdc   : > { %1805 = vmatmul.mubr.bf16.gmra.mrb[24].mxu0 %v3646_v54  ;;  %2471 = vmatprep.mubr.msk.bf16.mxu1 %vm645_vm0, %v3080_v4 }
  0xdd   : > { %2695 = vmatprep.mubr.msk.bf16.mxu0 %vm645_vm0, %v3062_v56 }
  0xe3   : > { %847 = vmatmul.mubr.bf16.gmra.mrb[60].mxu1 %v3082_v5 }
  0xe4   : > { %1813 = vmatmul.mubr.bf16.gmra.mrb[28].mxu0 %v3064_v57  ;;  %2580 = vmatprep.mubr.msk.bf16.mxu1 %vm645_vm0, %v3062_v56 }
  0xe5   : > { %2696 = vmatprep.mubr.msk.bf16.mxu0 %vm645_vm0, %v3065_v58 }
  0xeb   : > { %1306 = vmatmul.mubr.bf16.vlgmr.msra.gmra.mrb[32].mxu1 %v3064_v57 }
  0xec   : > { %1821 = vmatmul.mubr.bf16.gmra.mrb[32].mxu0 %v3067_v59  ;;  %2581 = vmatprep.mubr.msk.bf16.mxu1 %vm645_vm0, %v3065_v58 }
  0xed   : > { %2697 = vmatprep.mubr.msk.bf16.mxu0 %vm645_vm0, %v3068_v60 }
  0xf3   : > { %1314 = vmatmul.mubr.bf16.gmra.mrb[36].mxu1 %v3067_v59 }
  0xf4   : > { %1829 = vmatmul.mubr.bf16.gmra.mrb[36].mxu0 %v3070_v61  ;;  %2582 = vmatprep.mubr.msk.bf16.mxu1 %vm645_vm0, %v3068_v60 }
  0xf5   : > { %2698 = vmatprep.mubr.msk.bf16.mxu0 %vm645_vm0, %v3071_v62 }
  0xfb   : > { %1322 = vmatmul.mubr.bf16.gmra.mrb[40].mxu1 %v3070_v61  ;;  %v3778_v61 = vld [vmem:[%s4010_s3] ss:$0 sm:$0xff] }
  0xfc   : > { %1837 = vmatmul.mubr.bf16.gmra.mrb[40].mxu0 %v3073_v63  ;;  %2583 = vmatprep.mubr.msk.bf16.mxu1 %vm645_vm0, %v3071_v62 }
  0xfd   : > { %2699 = vmatprep.mubr.msk.bf16.mxu0 %vm645_vm0, %v3074_v0 }
 0x103   : > { %1330 = vmatmul.mubr.bf16.gmra.mrb[44].mxu1 %v3073_v63 }
 0x104   : > { %1845 = vmatmul.mubr.bf16.gmra.mrb[44].mxu0 %v3076_v1  ;;  %2584 = vmatprep.mubr.msk.bf16.mxu1 %vm645_vm0, %v3074_v0 }
 0x105   : > { %2700 = vmatprep.mubr.msk.bf16.mxu0 %vm645_vm0, %v3077_v2 }
 0x10b   : > { %1338 = vmatmul.mubr.bf16.gmra.mrb[48].mxu1 %v3076_v1 }
 0x10c   : > { %1853 = vmatmul.mubr.bf16.gmra.mrb[48].mxu0 %v3079_v3  ;;  %2585 = vmatprep.mubr.msk.bf16.mxu1 %vm645_vm0, %v3077_v2  ;;  %v345_v2 = vld [vmem:[#allocation2 + $0x20] sm:$0xff] }
 0x10d   : > { %2701 = vmatprep.mubr.msk.bf16.mxu0 %vm645_vm0, %v3080_v4 }
 0x113   : > { %1346 = vmatmul.mubr.bf16.gmra.mrb[52].mxu1 %v3079_v3 }
 0x114   : > { %1861 = vmatmul.mubr.bf16.gmra.mrb[52].mxu0 %v3082_v5  ;;  %2586 = vmatprep.mubr.msk.bf16.mxu1 %vm645_vm0, %v3080_v4 }
 0x115   : > { %2702 = vmatprep.mubr.msk.bf16.mxu0 %vm645_vm0, %v3083_v6 }
 0x11b   : > { %1354 = vmatmul.mubr.bf16.gmra.mrb[56].mxu1 %v3082_v5 }
 0x11c   : > { %1869 = vmatmul.mubr.bf16.gmra.mrb[56].mxu0 %v3085_v7  ;;  %2587 = vmatprep.mubr.msk.bf16.mxu1 %vm645_vm0, %v3083_v6  ;;  %v346_v6 = vld [vmem:[#allocation2 + $0x28] sm:$0xff] }
 0x11d   : > { %2703 = vmatprep.mubr.msk.bf16.mxu0 %vm645_vm0, %v3086_v8 }
 0x123   : > { %1362 = vmatmul.mubr.bf16.gmra.mrb[60].mxu1 %v3085_v7 }
 0x124   : > { %1877 = vmatmul.mubr.bf16.gmra.mrb[60].mxu0 %v3088_v9 }
 0x13e   : > { %v728_v10 = vpop.f32.mrb[0].mxu1 }
 0x13f   : > { %v730_v11 = vpop.f32.mrb[1].mxu1  ;;  %v855_v44 = vadd.f32 %v728_v10, %v341_v42 }
 0x140   : > { %v731_v12 = vpop.f32.mrb[2].mxu1 }
 0x141   : > { %v733_v13 = vpop.f32.mrb[3].mxu1  ;;  %v856_v46 = vadd.f32 %v731_v12, %v342_v43 }
 0x146   : > { %v736_v14 = vpop.f32.mrb[4].mxu1 }
 0x147   : > { %v738_v15 = vpop.f32.mrb[5].mxu1  ;;  %v857_v54 = vadd.f32 %v736_v14, %v343_v52 }
 0x148   : > { %v739_v16 = vpop.f32.mrb[6].mxu1 }
 0x149   : > { %v741_v17 = vpop.f32.mrb[7].mxu1  ;;  %v858_v57 = vadd.f32 %v739_v16, %v344_v53 }
 0x14e   : > { %v744_v18 = vpop.f32.mrb[8].mxu1 }
 0x14f   : > { %v746_v19 = vpop.f32.mrb[9].mxu1  ;;  %v859_v7 = vadd.f32 %v744_v18, %v345_v2 }
 0x150   : > { %v747_v20 = vpop.f32.mrb[10].mxu1 }
 0x151   : > { %v749_v21 = vpop.f32.mrb[11].mxu1  ;;  %v860_v11 = vadd.f32 %v747_v20, %v346_v6  ;;  %v347_v20 = vld [vmem:[#allocation2 + $0x30] sm:$0xff] }
 0x156   : > { %v3748_v22 = vpop.f32.mrb[12].mxu1 }
 0x157   : > { %v754_v23 = vpop.f32.mrb[13].mxu1 }
 0x158   : > { %v3750_v24 = vpop.f32.mrb[14].mxu1 }
 0x159   : > { %v757_v25 = vpop.f32.mrb[15].mxu1 }
 0x15e   : > { %v3752_v26 = vpop.f32.mrb[16].mxu1 }
 0x15f   : > { %v762_v27 = vpop.f32.mrb[17].mxu1 }
 0x160   : > { %v3754_v28 = vpop.f32.mrb[18].mxu1 }
 0x161   : > { %v765_v29 = vpop.f32.mrb[19].mxu1 }
 0x166   : > { %v3756_v30 = vpop.f32.mrb[20].mxu1 }
 0x167   : > { %v770_v31 = vpop.f32.mrb[21].mxu1 }
 0x168   : > { %v3758_v32 = vpop.f32.mrb[22].mxu1  ;;  %v348_v31 = vld [vmem:[#allocation2 + $0x38] sm:$0xff] }
 0x169   : > { %v773_v33 = vpop.f32.mrb[23].mxu1 }
 0x16a   : > { %v861_v33 = vadd.f32 %v3748_v22, %v347_v20 }
 0x16e   : > { %v3760_v34 = vpop.f32.mrb[24].mxu1 }
 0x16f   : > { %v778_v35 = vpop.f32.mrb[25].mxu1 }
 0x170   : > { %v3762_v36 = vpop.f32.mrb[26].mxu1 }
 0x171   : > { %v781_v37 = vpop.f32.mrb[27].mxu1 }
 0x176   : > { %v3764_v38 = vpop.f32.mrb[28].mxu1 }
 0x177   : > { %v786_v39 = vpop.f32.mrb[29].mxu1 }
 0x178   : > { %v3766_v40 = vpop.f32.mrb[30].mxu1 }
 0x179   : > { %v789_v41 = vpop.f32.mrb[31].mxu1 }
 0x17a   : > { %v862_v41 = vadd.f32 %v3750_v24, %v348_v31 }
 0x17f   : > { %v1758_v45 = vpop.f32.mrb[0].mxu0 }
 0x180   : > { %v2801_v47 = vadd.f32 %v1758_v45, %v855_v44  ;;  %v1760_v48 = vpop.f32.mrb[1].mxu0 }
 0x181   : > { %v1761_v49 = vpop.f32.mrb[2].mxu0 }
 0x182   : > { %1918 = vst.msk [vmem:[#allocation2] sm:$0xff] %vm308_vm1, %v2801_v47  ;;  %v2803_v50 = vadd.f32 %v1761_v49, %v856_v46  ;;  %v1763_v51 = vpop.f32.mrb[3].mxu0 }
 0x183   : > { %v349_v51 = vld [vmem:[#allocation2 + $0x40] sm:$0xff] }
 0x184   : > { %1919 = vst.msk [vmem:[#allocation2 + $0x8] sm:$0xff] %vm308_vm1, %v2803_v50 }
 0x187   : > { %v1766_v56 = vpop.f32.mrb[4].mxu0 }
 0x188   : > { %v2805_v58 = vadd.f32 %v1766_v56, %v857_v54  ;;  %v1768_v59 = vpop.f32.mrb[5].mxu0  ;;  %v350_v54 = vld [vmem:[#allocation2 + $0x48] sm:$0xff]  ;;  %v863_v56 = vadd.f32 %v3752_v26, %v349_v51 }
 0x189   : > { %v1953_v60 = vld [vmem:[#allocation2] sm:$0xff]  ;;  %v1769_v62 = vpop.f32.mrb[6].mxu0 }
 0x18a   : > { %v1992_v63 = vmul.f32 %v3773_v55, %v1953_v60  ;;  %1920 = vst.msk [vmem:[#allocation2 + $0x10] sm:$0xff] %vm308_vm1, %v2805_v58  ;;  %v2807_v0 = vadd.f32 %v1769_v62, %v858_v57  ;;  %v1771_v1 = vpop.f32.mrb[7].mxu0  ;;  %v864_v60 = vadd.f32 %v3754_v28, %v350_v54  ;;  %v356_v54 = vld [vmem:[#allocation2 + $0x78] sm:$0xff] }
 0x18b   : > { %v1954_v3 = vld [vmem:[#allocation2 + $0x8] sm:$0xff] }
 0x18c   : > { %v2031_v4 = vadd.f32 %v3778_v61, %v1992_v63  ;;  %v1993_v5 = vmul.f32 %v3773_v55, %v1954_v3  ;;  %1921 = vst.msk [vmem:[#allocation2 + $0x18] sm:$0xff] %vm308_vm1, %v2807_v0 }
 0x18e   : > { %v2063_v8 = vmax.f32 %v2031_v4, 0.0  ;;  %v2032_v9 = vadd.f32 %v3778_v61, %v1993_v5 }
 0x18f   : > { %v1774_v10 = vpop.f32.mrb[8].mxu0 }
 0x190   : > { %v2743_v12 = vpack.c.bf16 %v2063_v8, %v2063_v8  ;;  %v2064_v13 = vmax.f32 %v2032_v9, 0.0  ;;  %v2809_v14 = vadd.f32 %v1774_v10, %v859_v7  ;;  %v1776_v15 = vpop.f32.mrb[9].mxu0  ;;  %v351_v7 = vld [vmem:[#allocation2 + $0x50] sm:$0xff]  ;;  %v352_v10 = vld [vmem:[#allocation2 + $0x58] sm:$0xff] }
 0x191   : > { %v1955_v16 = vld [vmem:[#allocation2 + $0x10] sm:$0xff]  ;;  %v1777_v17 = vpop.f32.mrb[10].mxu0  ;;  %v866_v15 = vadd.f32 %v3758_v32, %v352_v10 }
 0x192   : > { %2224 = vst.msk [vmem:[%s3787_s27] sm:$0xf] %vm2223_vm2, %v2743_v12  ;;  %v2744_v19 = vpack.c.bf16 %v2064_v13, %v2064_v13  ;;  %v1994_v18 = vmul.f32 %v3773_v55, %v1955_v16  ;;  %v2811_v21 = vadd.f32 %v1777_v17, %v860_v11  ;;  %v1779_v23 = vpop.f32.mrb[11].mxu0  ;;  %v865_v11 = vadd.f32 %v3756_v30, %v351_v7 }
 0x193   : > { %1922 = vst.msk [vmem:[#allocation2 + $0x20] sm:$0xff] %vm308_vm1, %v2809_v14  ;;  %v1956_v25 = vld [vmem:[#allocation2 + $0x18] sm:$0xff] }
 0x194   : > { %2225 = vst.msk [vmem:[%s3787_s27 + $0x4] sm:$0xf] %vm2223_vm2, %v2744_v19  ;;  %v2033_v27 = vadd.f32 %v3778_v61, %v1994_v18  ;;  %v1995_v29 = vmul.f32 %v3773_v55, %v1956_v25 }
 0x195   : > { %1923 = vst.msk [vmem:[#allocation2 + $0x28] sm:$0xff] %vm308_vm1, %v2811_v21 }
 0x196   : > { %v2065_v35 = vmax.f32 %v2033_v27, 0.0  ;;  %v2034_v37 = vadd.f32 %v3778_v61, %v1995_v29  ;;  %v353_v29 = vld [vmem:[#allocation2 + $0x60] sm:$0xff] }
 0x197   : > { %v1782_v39 = vpop.f32.mrb[12].mxu0 }
 0x198   : > { %v2745_v42 = vpack.c.bf16 %v2065_v35, %v2065_v35  ;;  %v2066_v43 = vmax.f32 %v2034_v37, 0.0  ;;  %v2813_v44 = vadd.f32 %v1782_v39, %v861_v33  ;;  %v1784_v45 = vpop.f32.mrb[13].mxu0  ;;  %v354_v35 = vld [vmem:[#allocation2 + $0x68] sm:$0xff]  ;;  %v867_v37 = vadd.f32 %v3760_v34, %v353_v29 }
 0x199   : > { %v1785_v47 = vpop.f32.mrb[14].mxu0 }
 0x19a   : > { %v1957_v46 = vld [vmem:[#allocation2 + $0x20] sm:$0xff]  ;;  %2226 = vst.msk [vmem:[%s3787_s27 + $0x8] sm:$0xf] %vm2223_vm2, %v2745_v42  ;;  %v2746_v48 = vpack.c.bf16 %v2066_v43, %v2066_v43  ;;  %v2815_v22 = vadd.f32 %v1785_v47, %v862_v41  ;;  %v1787_v50 = vpop.f32.mrb[15].mxu0  ;;  %v868_v43 = vadd.f32 %v3762_v36, %v354_v35 }
 0x19b   : > { %v1996_v49 = vmul.f32 %v3773_v55, %v1957_v46  ;;  %1924 = vst.msk [vmem:[#allocation2 + $0x30] sm:$0xff] %vm308_vm1, %v2813_v44 }
 0x19c   : > { %v1958_v52 = vld [vmem:[#allocation2 + $0x28] sm:$0xff]  ;;  %2227 = vst.msk [vmem:[%s3787_s27 + $0xc] sm:$0xf] %vm2223_vm2, %v2746_v48 }
 0x19d   : > { %v2035_v24 = vadd.f32 %v3778_v61, %v1996_v49  ;;  %v1997_v53 = vmul.f32 %v3773_v55, %v1958_v52  ;;  %1925 = vst.msk [vmem:[#allocation2 + $0x38] sm:$0xff] %vm308_vm1, %v2815_v22  ;;  %v355_v52 = vld [vmem:[#allocation2 + $0x70] sm:$0xff] }
 0x19f   : > { %v2067_v57 = vmax.f32 %v2035_v24, 0.0  ;;  %v2036_v58 = vadd.f32 %v3778_v61, %v1997_v53  ;;  %v1790_v59 = vpop.f32.mrb[16].mxu0 }
 0x1a0   : > { %v2817_v0 = vadd.f32 %v1790_v59, %v863_v56  ;;  %v1792_v1 = vpop.f32.mrb[17].mxu0  ;;  %v869_v56 = vadd.f32 %v3764_v38, %v355_v52 }
 0x1a1   : > { %v2747_v62 = vpack.c.bf16 %v2067_v57, %v2067_v57  ;;  %v2068_v63 = vmax.f32 %v2036_v58, 0.0  ;;  %v1793_v3 = vpop.f32.mrb[18].mxu0 }
 0x1a2   : > { %v1959_v2 = vld [vmem:[#allocation2 + $0x30] sm:$0xff]  ;;  %1926 = vst.msk [vmem:[#allocation2 + $0x40] sm:$0xff] %vm308_vm1, %v2817_v0  ;;  %v2819_v26 = vadd.f32 %v1793_v3, %v864_v60  ;;  %v1795_v6 = vpop.f32.mrb[19].mxu0  ;;  %v870_v60 = vadd.f32 %v3766_v40, %v356_v54 }
 0x1a3   : > { %2228 = vst.msk [vmem:[%s3787_s27 + $0x10] sm:$0xf] %vm2223_vm2, %v2747_v62  ;;  %v2748_v4 = vpack.c.bf16 %v2068_v63, %v2068_v63  ;;  %v1998_v5 = vmul.f32 %v3773_v55, %v1959_v2 }
 0x1a4   : > { %v1960_v8 = vld [vmem:[#allocation2 + $0x38] sm:$0xff]  ;;  %1927 = vst.msk [vmem:[#allocation2 + $0x48] sm:$0xff] %vm308_vm1, %v2819_v26 }
 0x1a5   : > { %2229 = vst.msk [vmem:[%s3787_s27 + $0x14] sm:$0xf] %vm2223_vm2, %v2748_v4  ;;  %v2037_v28 = vadd.f32 %v3778_v61, %v1998_v5  ;;  %v1999_v9 = vmul.f32 %v3773_v55, %v1960_v8  ;;  %v357_v8 = vld [vmem:[#allocation2 + $0x80] sm:$0xff] }
 0x1a7   : > { %v2069_v12 = vmax.f32 %v2037_v28, 0.0  ;;  %v2038_v13 = vadd.f32 %v3778_v61, %v1999_v9  ;;  %v1798_v14 = vpop.f32.mrb[20].mxu0 }
 0x1a8   : > { %v2821_v19 = vadd.f32 %v1798_v14, %v865_v11  ;;  %v1800_v18 = vpop.f32.mrb[21].mxu0  ;;  %v358_v11 = vld [vmem:[#allocation2 + $0x88] sm:$0xff] }
 0x1a9   : > { %v2749_v16 = vpack.c.bf16 %v2069_v12, %v2069_v12  ;;  %v2070_v17 = vmax.f32 %v2038_v13, 0.0  ;;  %v1961_v21 = vld [vmem:[#allocation2 + $0x40] sm:$0xff]  ;;  %v1801_v23 = vpop.f32.mrb[22].mxu0 }
 0x1aa   : > { %v2000_v25 = vmul.f32 %v3773_v55, %v1961_v21  ;;  %1928 = vst.msk [vmem:[#allocation2 + $0x50] sm:$0xff] %vm308_vm1, %v2821_v19  ;;  %v2823_v30 = vadd.f32 %v1801_v23, %v866_v15  ;;  %v1803_v27 = vpop.f32.mrb[23].mxu0 }
 0x1ab   : > { %2230 = vst.msk [vmem:[%s3787_s27 + $0x18] sm:$0xf] %vm2223_vm2, %v2749_v16  ;;  %v2750_v20 = vpack.c.bf16 %v2070_v17, %v2070_v17  ;;  %v1962_v31 = vld [vmem:[#allocation2 + $0x48] sm:$0xff] }
 0x1ac   : > { %v2039_v32 = vadd.f32 %v3778_v61, %v2000_v25  ;;  %v2001_v33 = vmul.f32 %v3773_v55, %v1962_v31  ;;  %1929 = vst.msk [vmem:[#allocation2 + $0x58] sm:$0xff] %vm308_vm1, %v2823_v30 }
 0x1ad   : > { %2231 = vst.msk [vmem:[%s3787_s27 + $0x1c] sm:$0xf] %vm2223_vm2, %v2750_v20 }
 0x1ae   : > { %v2071_v39 = vmax.f32 %v2039_v32, 0.0  ;;  %v2040_v41 = vadd.f32 %v3778_v61, %v2001_v33 }
 0x1af   : > { %v1806_v42 = vpop.f32.mrb[24].mxu0 }
 0x1b0   : > { %v2751_v44 = vpack.c.bf16 %v2071_v39, %v2071_v39  ;;  %v2072_v45 = vmax.f32 %v2040_v41, 0.0  ;;  %v2825_v46 = vadd.f32 %v1806_v42, %v867_v37  ;;  %v1808_v47 = vpop.f32.mrb[25].mxu0  ;;  %v359_v37 = vld [vmem:[#allocation2 + $0x90] sm:$0xff] }
 0x1b1   : > { %v1963_v48 = vld [vmem:[#allocation2 + $0x50] sm:$0xff]  ;;  %v1809_v49 = vpop.f32.mrb[26].mxu0 }
 0x1b2   : > { %2232 = vst.msk [vmem:[%s3787_s27 + $0x20] sm:$0xf] %vm2223_vm2, %v2751_v44  ;;  %v2752_v22 = vpack.c.bf16 %v2072_v45, %v2072_v45  ;;  %v2002_v50 = vmul.f32 %v3773_v55, %v1963_v48  ;;  %v2827_v34 = vadd.f32 %v1809_v49, %v868_v43  ;;  %v1811_v51 = vpop.f32.mrb[27].mxu0  ;;  %v360_v43 = vld [vmem:[#allocation2 + $0x98] sm:$0xff] }
 0x1b3   : > { %1930 = vst.msk [vmem:[#allocation2 + $0x60] sm:$0xff] %vm308_vm1, %v2825_v46  ;;  %v1964_v24 = vld [vmem:[#allocation2 + $0x58] sm:$0xff] }
 0x1b4   : > { %2233 = vst.msk [vmem:[%s3787_s27 + $0x24] sm:$0xf] %vm2223_vm2, %v2752_v22  ;;  %v2041_v36 = vadd.f32 %v3778_v61, %v2002_v50  ;;  %v2003_v53 = vmul.f32 %v3773_v55, %v1964_v24 }
 0x1b5   : > { %1931 = vst.msk [vmem:[#allocation2 + $0x68] sm:$0xff] %vm308_vm1, %v2827_v34 }
 0x1b6   : > { %v2073_v57 = vmax.f32 %v2041_v36, 0.0  ;;  %v2042_v58 = vadd.f32 %v3778_v61, %v2003_v53 }
 0x1b7   : > { %v1814_v59 = vpop.f32.mrb[28].mxu0 }
 0x1b8   : > { %v2753_v62 = vpack.c.bf16 %v2073_v57, %v2073_v57  ;;  %v2074_v63 = vmax.f32 %v2042_v58, 0.0  ;;  %v2829_v0 = vadd.f32 %v1814_v59, %v869_v56  ;;  %v1816_v1 = vpop.f32.mrb[29].mxu0  ;;  %v361_v58 = vld [vmem:[#allocation2 + $0xa0] sm:$0xff] }
 0x1b9   : > { %v1817_v3 = vpop.f32.mrb[30].mxu0 }
 0x1ba   : > { %v1965_v2 = vld [vmem:[#allocation2 + $0x60] sm:$0xff]  ;;  %2234 = vst.msk [vmem:[%s3787_s27 + $0x28] sm:$0xf] %vm2223_vm2, %v2753_v62  ;;  %v2754_v4 = vpack.c.bf16 %v2074_v63, %v2074_v63  ;;  %v2831_v38 = vadd.f32 %v1817_v3, %v870_v60  ;;  %v1819_v26 = vpop.f32.mrb[31].mxu0  ;;  %v362_v63 = vld [vmem:[#allocation2 + $0xa8] sm:$0xff] }
 0x1bb   : > { %v2004_v5 = vmul.f32 %v3773_v55, %v1965_v2  ;;  %1932 = vst.msk [vmem:[#allocation2 + $0x70] sm:$0xff] %vm308_vm1, %v2829_v0 }
 0x1bc   : > { %v1966_v6 = vld [vmem:[#allocation2 + $0x68] sm:$0xff]  ;;  %2235 = vst.msk [vmem:[%s3787_s27 + $0x2c] sm:$0xf] %vm2223_vm2, %v2754_v4 }
 0x1bd   : > { %v2043_v40 = vadd.f32 %v3778_v61, %v2004_v5  ;;  %v2005_v7 = vmul.f32 %v3773_v55, %v1966_v6  ;;  %1933 = vst.msk [vmem:[#allocation2 + $0x78] sm:$0xff] %vm308_vm1, %v2831_v38 }
 0x1be   : > { %v1307_v10 = vpop.f32.mrb[32].mxu1 }
 0x1bf   : > { %v2075_v28 = vmax.f32 %v2043_v40, 0.0  ;;  %v2044_v9 = vadd.f32 %v3778_v61, %v2005_v7  ;;  %v2832_v12 = vadd.f32 %v1307_v10, %v357_v8  ;;  %v1822_v13 = vpop.f32.mrb[32].mxu0  ;;  %v1309_v14 = vpop.f32.mrb[33].mxu1 }
 0x1c0   : > { %v1824_v17 = vpop.f32.mrb[33].mxu0  ;;  %v1310_v19 = vpop.f32.mrb[34].mxu1 }
 0x1c1   : > { %v2755_v15 = vpack.c.bf16 %v2075_v28, %v2075_v28  ;;  %v2076_v16 = vmax.f32 %v2044_v9, 0.0  ;;  %v2833_v21 = vadd.f32 %v2832_v12, %v1822_v13  ;;  %v2834_v23 = vadd.f32 %v1310_v19, %v358_v11  ;;  %v1825_v20 = vpop.f32.mrb[34].mxu0  ;;  %v1312_v25 = vpop.f32.mrb[35].mxu1 }
 0x1c2   : > { %v1967_v18 = vld [vmem:[#allocation2 + $0x70] sm:$0xff]  ;;  %v1827_v29 = vpop.f32.mrb[35].mxu0 }
 0x1c3   : > { %2236 = vst.msk [vmem:[%s3787_s27 + $0x30] sm:$0xf] %vm2223_vm2, %v2755_v15  ;;  %v2756_v30 = vpack.c.bf16 %v2076_v16, %v2076_v16  ;;  %v2006_v27 = vmul.f32 %v3773_v55, %v1967_v18  ;;  %v2835_v32 = vadd.f32 %v2834_v23, %v1825_v20  ;;  %v363_v15 = vld [vmem:[#allocation2 + $0xb0] sm:$0xff]  ;;  %v364_v18 = vld [vmem:[#allocation2 + $0xb8] sm:$0xff] }
 0x1c4   : > { %v1968_v31 = vld [vmem:[#allocation2 + $0x78] sm:$0xff]  ;;  %1934 = vst.msk [vmem:[#allocation2 + $0x80] sm:$0xff] %vm308_vm1, %v2833_v21 }
 0x1c5   : > { %2237 = vst.msk [vmem:[%s3787_s27 + $0x34] sm:$0xf] %vm2223_vm2, %v2756_v30  ;;  %v2045_v33 = vadd.f32 %v3778_v61, %v2006_v27  ;;  %v2007_v35 = vmul.f32 %v3773_v55, %v1968_v31 }
 0x1c6   : > { %1935 = vst.msk [vmem:[#allocation2 + $0x88] sm:$0xff] %vm308_vm1, %v2835_v32  ;;  %v1315_v42 = vpop.f32.mrb[36].mxu1 }
 0x1c7   : > { %v2077_v39 = vmax.f32 %v2045_v33, 0.0  ;;  %v2046_v41 = vadd.f32 %v3778_v61, %v2007_v35  ;;  %v2836_v44 = vadd.f32 %v1315_v42, %v359_v37  ;;  %v1830_v45 = vpop.f32.mrb[36].mxu0  ;;  %v1317_v46 = vpop.f32.mrb[37].mxu1 }
 0x1c8   : > { %v1832_v49 = vpop.f32.mrb[37].mxu0  ;;  %v1318_v22 = vpop.f32.mrb[38].mxu1 }
 0x1c9   : > { %v2757_v47 = vpack.c.bf16 %v2077_v39, %v2077_v39  ;;  %v2078_v48 = vmax.f32 %v2046_v41, 0.0  ;;  %v2837_v50 = vadd.f32 %v2836_v44, %v1830_v45  ;;  %v2838_v34 = vadd.f32 %v1318_v22, %v360_v43  ;;  %v1833_v51 = vpop.f32.mrb[38].mxu0  ;;  %v1320_v52 = vpop.f32.mrb[39].mxu1 }
 0x1ca   : > { %v1835_v53 = vpop.f32.mrb[39].mxu0 }
 0x1cb   : > { %2238 = vst.msk [vmem:[%s3787_s27 + $0x38] sm:$0xf] %vm2223_vm2, %v2757_v47  ;;  %v2758_v24 = vpack.c.bf16 %v2078_v48, %v2078_v48  ;;  %v1969_v36 = vld [vmem:[#allocation2 + $0x80] sm:$0xff]  ;;  %v2839_v56 = vadd.f32 %v2838_v34, %v1833_v51 }
 0x1cc   : > { %v2008_v54 = vmul.f32 %v3773_v55, %v1969_v36  ;;  %1936 = vst.msk [vmem:[#allocation2 + $0x90] sm:$0xff] %vm308_vm1, %v2837_v50  ;;  %v365_v47 = vld [vmem:[#allocation2 + $0xc0] sm:$0xff]  ;;  %v366_v50 = vld [vmem:[#allocation2 + $0xc8] sm:$0xff] }
 0x1cd   : > { %2239 = vst.msk [vmem:[%s3787_s27 + $0x3c] sm:$0xf] %vm2223_vm2, %v2758_v24  ;;  %v1970_v57 = vld [vmem:[#allocation2 + $0x88] sm:$0xff] }
 0x1ce   : > { %v2047_v59 = vadd.f32 %v3778_v61, %v2008_v54  ;;  %v2009_v60 = vmul.f32 %v3773_v55, %v1970_v57  ;;  %1937 = vst.msk [vmem:[#allocation2 + $0x98] sm:$0xff] %vm308_vm1, %v2839_v56  ;;  %v1323_v62 = vpop.f32.mrb[40].mxu1 }
 0x1cf   : > { %v2840_v2 = vadd.f32 %v1323_v62, %v361_v58  ;;  %v1838_v3 = vpop.f32.mrb[40].mxu0  ;;  %v1325_v4 = vpop.f32.mrb[41].mxu1 }
 0x1d0   : > { %v2079_v0 = vmax.f32 %v2047_v59, 0.0  ;;  %v2048_v1 = vadd.f32 %v3778_v61, %v2009_v60  ;;  %v1840_v5 = vpop.f32.mrb[41].mxu0  ;;  %v1326_v38 = vpop.f32.mrb[42].mxu1 }
 0x1d1   : > { %v2841_v40 = vadd.f32 %v2840_v2, %v1838_v3  ;;  %v2842_v7 = vadd.f32 %v1326_v38, %v362_v63  ;;  %v1841_v8 = vpop.f32.mrb[42].mxu0  ;;  %v1328_v28 = vpop.f32.mrb[43].mxu1  ;;  %v367_v5 = vld [vmem:[#allocation2 + $0xd0] sm:$0xff] }
 0x1d2   : > { %v2759_v26 = vpack.c.bf16 %v2079_v0, %v2079_v0  ;;  %v2080_v6 = vmax.f32 %v2048_v1, 0.0  ;;  %v1843_v10 = vpop.f32.mrb[43].mxu0 }
 0x1d3   : > { %v1971_v9 = vld [vmem:[#allocation2 + $0x90] sm:$0xff]  ;;  %1938 = vst.msk [vmem:[#allocation2 + $0xa0] sm:$0xff] %vm308_vm1, %v2841_v40  ;;  %v2843_v13 = vadd.f32 %v2842_v7, %v1841_v8  ;;  %v368_v40 = vld [vmem:[#allocation2 + $0xd8] sm:$0xff] }
 0x1d4   : > { %2240 = vst.msk [vmem:[%s3787_s27 + $0x40] sm:$0xf] %vm2223_vm2, %v2759_v26  ;;  %v2760_v11 = vpack.c.bf16 %v2080_v6, %v2080_v6  ;;  %v2010_v12 = vmul.f32 %v3773_v55, %v1971_v9 }
 0x1d5   : > { %v1972_v14 = vld [vmem:[#allocation2 + $0x98] sm:$0xff]  ;;  %1939 = vst.msk [vmem:[#allocation2 + $0xa8] sm:$0xff] %vm308_vm1, %v2843_v13 }
 0x1d6   : > { %2241 = vst.msk [vmem:[%s3787_s27 + $0x44] sm:$0xf] %vm2223_vm2, %v2760_v11  ;;  %v2049_v16 = vadd.f32 %v3778_v61, %v2010_v12  ;;  %v2011_v17 = vmul.f32 %v3773_v55, %v1972_v14  ;;  %v1331_v19 = vpop.f32.mrb[44].mxu1 }
 0x1d7   : > { %v2844_v20 = vadd.f32 %v1331_v19, %v363_v15  ;;  %v1846_v25 = vpop.f32.mrb[44].mxu0  ;;  %v1333_v30 = vpop.f32.mrb[45].mxu1 }
 0x1d8   : > { %v2081_v21 = vmax.f32 %v2049_v16, 0.0  ;;  %v2050_v23 = vadd.f32 %v3778_v61, %v2011_v17  ;;  %v1848_v27 = vpop.f32.mrb[45].mxu0  ;;  %v1334_v29 = vpop.f32.mrb[46].mxu1 }
 0x1d9   : > { %v2845_v33 = vadd.f32 %v2844_v20, %v1846_v25  ;;  %v2846_v35 = vadd.f32 %v1334_v29, %v364_v18  ;;  %v1849_v37 = vpop.f32.mrb[46].mxu0  ;;  %v1336_v39 = vpop.f32.mrb[47].mxu1  ;;  %v369_v27 = vld [vmem:[#allocation2 + $0xe0] sm:$0xff] }
 0x1da   : > { %v2761_v31 = vpack.c.bf16 %v2081_v21, %v2081_v21  ;;  %v2082_v32 = vmax.f32 %v2050_v23, 0.0  ;;  %v1973_v41 = vld [vmem:[#allocation2 + $0xa0] sm:$0xff]  ;;  %v1851_v42 = vpop.f32.mrb[47].mxu0 }
 0x1db   : > { %v2012_v44 = vmul.f32 %v3773_v55, %v1973_v41  ;;  %1940 = vst.msk [vmem:[#allocation2 + $0xb0] sm:$0xff] %vm308_vm1, %v2845_v33  ;;  %v2847_v45 = vadd.f32 %v2846_v35, %v1849_v37  ;;  %v370_v33 = vld [vmem:[#allocation2 + $0xe8] sm:$0xff] }
 0x1dc   : > { %2242 = vst.msk [vmem:[%s3787_s27 + $0x48] sm:$0xf] %vm2223_vm2, %v2761_v31  ;;  %v2762_v43 = vpack.c.bf16 %v2082_v32, %v2082_v32  ;;  %v1974_v46 = vld [vmem:[#allocation2 + $0xa8] sm:$0xff] }
 0x1dd   : > { %v2051_v48 = vadd.f32 %v3778_v61, %v2012_v44  ;;  %v2013_v49 = vmul.f32 %v3773_v55, %v1974_v46  ;;  %1941 = vst.msk [vmem:[#allocation2 + $0xb8] sm:$0xff] %vm308_vm1, %v2847_v45 }
 0x1de   : > { %2243 = vst.msk [vmem:[%s3787_s27 + $0x4c] sm:$0xf] %vm2223_vm2, %v2762_v43  ;;  %v1339_v22 = vpop.f32.mrb[48].mxu1 }
 0x1df   : > { %v2083_v34 = vmax.f32 %v2051_v48, 0.0  ;;  %v2052_v51 = vadd.f32 %v3778_v61, %v2013_v49  ;;  %v2848_v52 = vadd.f32 %v1339_v22, %v365_v47  ;;  %v1854_v24 = vpop.f32.mrb[48].mxu0  ;;  %v1341_v36 = vpop.f32.mrb[49].mxu1 }
 0x1e0   : > { %v1856_v53 = vpop.f32.mrb[49].mxu0  ;;  %v1342_v54 = vpop.f32.mrb[50].mxu1 }
 0x1e1   : > { %v2763_v56 = vpack.c.bf16 %v2083_v34, %v2083_v34  ;;  %v2084_v57 = vmax.f32 %v2052_v51, 0.0  ;;  %v2849_v58 = vadd.f32 %v2848_v52, %v1854_v24  ;;  %v2850_v59 = vadd.f32 %v1342_v54, %v366_v50  ;;  %v1857_v60 = vpop.f32.mrb[50].mxu0  ;;  %v1344_v62 = vpop.f32.mrb[51].mxu1  ;;  %v371_v53 = vld [vmem:[#allocation2 + $0xf0] sm:$0xff] }
 0x1e2   : > { %v1975_v63 = vld [vmem:[#allocation2 + $0xb0] sm:$0xff]  ;;  %v1859_v0 = vpop.f32.mrb[51].mxu0 }
 0x1e3   : > { %2244 = vst.msk [vmem:[%s3787_s27 + $0x50] sm:$0xf] %vm2223_vm2, %v2763_v56  ;;  %v2764_v1 = vpack.c.bf16 %v2084_v57, %v2084_v57  ;;  %v2014_v2 = vmul.f32 %v3773_v55, %v1975_v63  ;;  %v2851_v3 = vadd.f32 %v2850_v59, %v1857_v60 }
 0x1e4   : > { %1942 = vst.msk [vmem:[#allocation2 + $0xc0] sm:$0xff] %vm308_vm1, %v2849_v58  ;;  %v1976_v4 = vld [vmem:[#allocation2 + $0xb8] sm:$0xff] }
 0x1e5   : > { %2245 = vst.msk [vmem:[%s3787_s27 + $0x54] sm:$0xf] %vm2223_vm2, %v2764_v1  ;;  %v2053_v38 = vadd.f32 %v3778_v61, %v2014_v2  ;;  %v2015_v26 = vmul.f32 %v3773_v55, %v1976_v4  ;;  %v372_v58 = vld [vmem:[#allocation2 + $0xf8] sm:$0xff] }
 0x1e6   : > { %1943 = vst.msk [vmem:[#allocation2 + $0xc8] sm:$0xff] %vm308_vm1, %v2851_v3  ;;  %v1347_v6 = vpop.f32.mrb[52].mxu1 }
 0x1e7   : > { %v2085_v7 = vmax.f32 %v2053_v38, 0.0  ;;  %v2054_v8 = vadd.f32 %v3778_v61, %v2015_v26  ;;  %v2852_v28 = vadd.f32 %v1347_v6, %v367_v5  ;;  %v1862_v9 = vpop.f32.mrb[52].mxu0  ;;  %v1349_v10 = vpop.f32.mrb[53].mxu1 }
 0x1e8   : > { %v1864_v11 = vpop.f32.mrb[53].mxu0  ;;  %v1350_v12 = vpop.f32.mrb[54].mxu1 }
 0x1e9   : > { %v2765_v13 = vpack.c.bf16 %v2085_v7, %v2085_v7  ;;  %v2086_v14 = vmax.f32 %v2054_v8, 0.0  ;;  %v2853_v15 = vadd.f32 %v2852_v28, %v1862_v9  ;;  %v2854_v16 = vadd.f32 %v1350_v12, %v368_v40  ;;  %v1865_v17 = vpop.f32.mrb[54].mxu0  ;;  %v1352_v19 = vpop.f32.mrb[55].mxu1 }
 0x1ea   : > { %v1867_v21 = vpop.f32.mrb[55].mxu0 }
 0x1eb   : > { %v1977_v18 = vld [vmem:[#allocation2 + $0xc0] sm:$0xff]  ;;  %2246 = vst.msk [vmem:[%s3787_s27 + $0x58] sm:$0xf] %vm2223_vm2, %v2765_v13  ;;  %v2766_v23 = vpack.c.bf16 %v2086_v14, %v2086_v14  ;;  %v2855_v25 = vadd.f32 %v2854_v16, %v1865_v17 }
 0x1ec   : > { %v2016_v20 = vmul.f32 %v3773_v55, %v1977_v18  ;;  %1944 = vst.msk [vmem:[#allocation2 + $0xd0] sm:$0xff] %vm308_vm1, %v2853_v15 }
 0x1ed   : > { %v1978_v30 = vld [vmem:[#allocation2 + $0xc8] sm:$0xff]  ;;  %2247 = vst.msk [vmem:[%s3787_s27 + $0x5c] sm:$0xf] %vm2223_vm2, %v2766_v23 }
 0x1ee   : > { %v2055_v29 = vadd.f32 %v3778_v61, %v2016_v20  ;;  %v2017_v31 = vmul.f32 %v3773_v55, %v1978_v30  ;;  %1945 = vst.msk [vmem:[#allocation2 + $0xd8] sm:$0xff] %vm308_vm1, %v2855_v25  ;;  %v1355_v32 = vpop.f32.mrb[56].mxu1 }
 0x1ef   : > { %v2856_v39 = vadd.f32 %v1355_v32, %v369_v27  ;;  %v1870_v41 = vpop.f32.mrb[56].mxu0  ;;  %v1357_v42 = vpop.f32.mrb[57].mxu1 }
 0x1f0   : > { %v2087_v35 = vmax.f32 %v2055_v29, 0.0  ;;  %v2056_v37 = vadd.f32 %v3778_v61, %v2017_v31  ;;  %v1872_v43 = vpop.f32.mrb[57].mxu0  ;;  %v1358_v44 = vpop.f32.mrb[58].mxu1 }
 0x1f1   : > { %v2857_v47 = vadd.f32 %v2856_v39, %v1870_v41  ;;  %v2858_v48 = vadd.f32 %v1358_v44, %v370_v33  ;;  %v1873_v49 = vpop.f32.mrb[58].mxu0  ;;  %v1360_v22 = vpop.f32.mrb[59].mxu1 }
 0x1f2   : > { %v2767_v45 = vpack.c.bf16 %v2087_v35, %v2087_v35  ;;  %v2088_v46 = vmax.f32 %v2056_v37, 0.0  ;;  %v1875_v34 = vpop.f32.mrb[59].mxu0 }
 0x1f3   : > { %v1979_v50 = vld [vmem:[#allocation2 + $0xd0] sm:$0xff]  ;;  %1946 = vst.msk [vmem:[#allocation2 + $0xe0] sm:$0xff] %vm308_vm1, %v2857_v47  ;;  %v2859_v24 = vadd.f32 %v2858_v48, %v1873_v49 }
 0x1f4   : > { %2248 = vst.msk [vmem:[%s3787_s27 + $0x60] sm:$0xf] %vm2223_vm2, %v2767_v45  ;;  %v2768_v51 = vpack.c.bf16 %v2088_v46, %v2088_v46  ;;  %v2018_v52 = vmul.f32 %v3773_v55, %v1979_v50 }
 0x1f5   : > { %v1980_v36 = vld [vmem:[#allocation2 + $0xd8] sm:$0xff]  ;;  %1947 = vst.msk [vmem:[#allocation2 + $0xe8] sm:$0xff] %vm308_vm1, %v2859_v24 }
 0x1f6   : > { %2249 = vst.msk [vmem:[%s3787_s27 + $0x64] sm:$0xf] %vm2223_vm2, %v2768_v51  ;;  %v2057_v54 = vadd.f32 %v3778_v61, %v2018_v52  ;;  %v2019_v56 = vmul.f32 %v3773_v55, %v1980_v36  ;;  %v1363_v57 = vpop.f32.mrb[60].mxu1 }
 0x1f7   : > { %v2860_v62 = vadd.f32 %v1363_v57, %v371_v53  ;;  %v1878_v63 = vpop.f32.mrb[60].mxu0  ;;  %v1365_v0 = vpop.f32.mrb[61].mxu1 }
 0x1f8   : > { %v2089_v59 = vmax.f32 %v2057_v54, 0.0  ;;  %v2058_v60 = vadd.f32 %v3778_v61, %v2019_v56  ;;  %v1880_v1 = vpop.f32.mrb[61].mxu0  ;;  %v1366_v2 = vpop.f32.mrb[62].mxu1 }
 0x1f9   : > { %v2861_v5 = vadd.f32 %v2860_v62, %v1878_v63  ;;  %v2862_v38 = vadd.f32 %v1366_v2, %v372_v58  ;;  %v1881_v26 = vpop.f32.mrb[62].mxu0  ;;  %v1368_v6 = vpop.f32.mrb[63].mxu1 }
 0x1fa   : > { %v2769_v3 = vpack.c.bf16 %v2089_v59, %v2089_v59  ;;  %v2090_v4 = vmax.f32 %v2058_v60, 0.0  ;;  %v1981_v40 = vld [vmem:[#allocation2 + $0xe0] sm:$0xff]  ;;  %v1883_v7 = vpop.f32.mrb[63].mxu0 }
 0x1fb   : > { %v2020_v28 = vmul.f32 %v3773_v55, %v1981_v40  ;;  %1948 = vst.msk [vmem:[#allocation2 + $0xf0] sm:$0xff] %vm308_vm1, %v2861_v5  ;;  %v2863_v9 = vadd.f32 %v2862_v38, %v1881_v26 }
 0x1fc   : > { %2250 = vst.msk [vmem:[%s3787_s27 + $0x68] sm:$0xf] %vm2223_vm2, %v2769_v3  ;;  %v2770_v8 = vpack.c.bf16 %v2090_v4, %v2090_v4  ;;  %v1982_v10 = vld [vmem:[#allocation2 + $0xe8] sm:$0xff] }
 0x1fd   : > { %v2059_v11 = vadd.f32 %v3778_v61, %v2020_v28  ;;  %v2021_v12 = vmul.f32 %v3773_v55, %v1982_v10  ;;  %1949 = vst.msk [vmem:[#allocation2 + $0xf8] sm:$0xff] %vm308_vm1, %v2863_v9 }
 0x1fe   : > { %2251 = vst.msk [vmem:[%s3787_s27 + $0x6c] sm:$0xf] %vm2223_vm2, %v2770_v8 }
 0x1ff   : > { %v2091_v13 = vmax.f32 %v2059_v11, 0.0  ;;  %v2060_v14 = vadd.f32 %v3778_v61, %v2021_v12 }
 0x201   : > { %v2771_v15 = vpack.c.bf16 %v2091_v13, %v2091_v13  ;;  %v2092_v16 = vmax.f32 %v2060_v14, 0.0 }
 0x202   : > { %v1983_v17 = vld [vmem:[#allocation2 + $0xf0] sm:$0xff] }
 0x203   : > { %2252 = vst.msk [vmem:[%s3787_s27 + $0x70] sm:$0xf] %vm2223_vm2, %v2771_v15  ;;  %v2772_v19 = vpack.c.bf16 %v2092_v16, %v2092_v16  ;;  %v2022_v18 = vmul.f32 %v3773_v55, %v1983_v17 }
 0x204   : > { %v1984_v21 = vld [vmem:[#allocation2 + $0xf8] sm:$0xff] }
 0x205   : > { %2253 = vst.msk [vmem:[%s3787_s27 + $0x74] sm:$0xf] %vm2223_vm2, %v2772_v19  ;;  %v2061_v23 = vadd.f32 %v3778_v61, %v2022_v18  ;;  %v2023_v20 = vmul.f32 %v3773_v55, %v1984_v21 }
 0x207   : > { %v2093_v25 = vmax.f32 %v2061_v23, 0.0  ;;  %v2062_v30 = vadd.f32 %v3778_v61, %v2023_v20 }
 0x209   : > { %v2773_v27 = vpack.c.bf16 %v2093_v25, %v2093_v25  ;;  %v2094_v29 = vmax.f32 %v2062_v30, 0.0 }
 0x20b   : > { %2254 = vst.msk [vmem:[%s3787_s27 + $0x78] sm:$0xf] %vm2223_vm2, %v2773_v27  ;;  %v2774_v55 = vpack.c.bf16 %v2094_v29, %v2094_v29 }
 0x20d   : > { %2255 = vst.msk [vmem:[%s3787_s27 + $0x7c] sm:$0xf] %vm2223_vm2, %v2774_v55 }
 0x20e   : > { %3132 = shalt.err (!%p3129_p4)
}
 0x20f   : > { %s3133_s26 = scalar_lea.hbm %s3952_s21, 2048  ;;  %s3137_s6 = scalar_lea.hbm %s4011_s4, 4096 }
 0x210   : > { %p3134_p6 = scmp.ne.s32.totalorder %s3952_s21, %s3133_s26  ;;  %p3138_p12 = scmp.lt.u32.totalorder %s3952_s21, %s4011_s4 }
 0x211   : > { %p3139_p1 = scmp.lt.u32.totalorder %s3137_s6, %s3133_s26  ;;  %p3141_p8 = scmp.lt.u32.totalorder %s3133_s26, %s3952_s21 }
 0x212   : > { %p3135_p7 = pnand %p3134_p6, %p4019_p9 }
 0x213   : > { %p3140_p3 = por %p3139_p1, %p3138_p12 }
 0x214   : > { %p3136_p10 = pneg %p3135_p7 }
 0x215   : > { %p3142_p11 = por %p3141_p8, %p3140_p3 }
 0x217   : > { %p3143_p0 = pnand %p3142_p11, %p3136_p10 }
 0x219   : > { %3146 = shalt.err (!%p3143_p0)
}
 0x21a   : > { %s3209_s7 = smov 64   ;;  %s3210_s10 = smov 4  }
 0x21b   : > { %2933 = dma.vmem_to_hbm [thread:$0]  (%p4019_p9), %s3954_s9, 2048, %s3952_s21, %s2257_s24, %s3209_s7, %s3209_s7, %s3210_s10  }
 0x21c PF: > { %s2286_s12 = sand.u32 1, %s3181_s15   ;;  %p4020_p5 = scmp.ne.s32.totalorder %s4016_s30, 0 }
 0x21d   : > { %p4021_p13 = scmp.ge.s32.totalorder %s3201_s20, 2  ;;  %s2287_s18 = scalar_lea.sflag [#allocation5], %s2286_s12 }
 0x21f   : > { %p2940_p2 = pnand %p4021_p13, %p4020_p5 }
 0x221   : > { %3176 = dma.done.wait (!%p2940_p2), %s2287_s18, 2048  }
 0x222   : > { %3178 = vsyncadd (!%p2940_p2), %s2287_s18, 4294965248  ;;  %s20_s20 = sadd.s32 1, %s3201_s20   ;;  %s4022_s15 = smov %s3185_s16 }
 0x223   : > { %p17_p4 = scmp.ge.s32.totalorder %s20_s20, 4   ;;  %s4023_s16 = smov %s3189_s17 }
 0x224   : > { %s4024_s17 = smov %s3292_s29  ;;  %s4025_s18 = smov %s3197_s19 }
 0x225   : > { %s4026_s19 = smov %s4028_s23  ;;  %19 = sbr.rel (!%p17_p4) target bundleno = 6 (0x6), region = 102 }
 0x22c   :  { %2292 = vsyncpa [#allocation4], 1 }
 0x22d   :  { %2294 = vsyncpa [#allocation4 + $0x1], 1 }
 0x22e   :  { %2295 = vsyncpa [#allocation5], 1 }
 0x22f   :  { %2297 = vsyncpa [#allocation5 + $0x1], 1 }

</bundles_post_ra>
